<compile_context>
chip_gen: v7x
topology: tpu7x:2x2x1
jax: 0.10.0
libtpu: 0.0.40
codegen_flags: <defaults>
</compile_context>

<pallas_src>
import functools

import jax
import jax.numpy as jnp
from jax.experimental import pallas as pl
from jax.experimental.pallas import tpu as pltpu

# (start, end) channel slices of the 12 attribute heads, matching the module.
GROUPS = (
    (0, 2), (2, 4), (4, 6), (6, 8), (8, 10), (10, 12),
    (12, 14), (14, 16), (16, 18), (18, 22), (22, 30), (30, 39),
)
NUM_CHANNELS = 39
NUM_ATTRS = len(GROUPS)
_NEG = -1.0e30


def _round_up(x, m):
    return (x + m - 1) // m * m


def _precise_dot(a, b):
    """a @ b with ~f32 accuracy even if the MXU rounds f32 operands to bf16.

    a is split into an exactly-bf16-representable high part and a small residual,
    so the result stays within ~1e-5 of a true f32 matmul regardless of the MXU's
    input precision.  b (0/1 membership matrix) is exact in either case.
    """
    a_hi = a.astype(jnp.bfloat16).astype(jnp.float32)
    a_lo = a - a_hi
    return (jnp.dot(a_hi, b, preferred_element_type=jnp.float32)
            + jnp.dot(a_lo, b, preferred_element_type=jnp.float32))


def _attribute_loss_kernel(logits_ref, attr_ref,
                           lse_sum_ref, cnt_ref, picked_ref,
                           *, batch, block_rows):
    tb = block_rows
    x = logits_ref[...].astype(jnp.float32)      # (TB, 39) — cast in-kernel (bf16 ok)
    t = attr_ref[...]                            # (TB, 12) int

    # ---- static index helpers, built ONCE per block from iota (no per-head iotas) ----
    chan = jax.lax.broadcasted_iota(jnp.int32, (1, NUM_CHANNELS), 1)     # (1,39)
    gid = jnp.zeros((1, NUM_CHANNELS), jnp.int32)                        # group id per channel
    gstart = jnp.zeros((1, NUM_CHANNELS), jnp.int32)                     # group start per channel
    for g in range(1, NUM_ATTRS):
        s_g, s_prev = GROUPS[g][0], GROUPS[g - 1][0]
        after = (chan >= s_g).astype(jnp.int32)
        gid = gid + after
        gstart = gstart + after * (s_g - s_prev)
    lane_off = (chan - gstart).astype(jnp.float32)                       # (1,39) offset in group

    # one-hot membership matrices (trace-time structure, built from iota + static compares)
    crow = jax.lax.broadcasted_iota(jnp.int32, (NUM_CHANNELS, NUM_ATTRS), 0)
    gcol = jax.lax.broadcasted_iota(jnp.int32, (NUM_CHANNELS, NUM_ATTRS), 1)
    gid_r = jnp.zeros((NUM_CHANNELS, NUM_ATTRS), jnp.int32)
    for g in range(1, NUM_ATTRS):
        gid_r = gid_r + (crow >= GROUPS[g][0]).astype(jnp.int32)
    m_mat = (gid_r == gcol).astype(jnp.float32)                          # (39,12): M[c,g]

    grow = jax.lax.broadcasted_iota(jnp.int32, (NUM_ATTRS, NUM_CHANNELS), 0)
    ccol = jax.lax.broadcasted_iota(jnp.int32, (NUM_ATTRS, NUM_CHANNELS), 1)
    gid_c = jnp.zeros((NUM_ATTRS, NUM_CHANNELS), jnp.int32)
    for g in range(1, NUM_ATTRS):
        gid_c = gid_c + (ccol >= GROUPS[g][0]).astype(jnp.int32)
    mt_mat = (gid_c == grow).astype(jnp.float32)                         # (12,39): M^T[g,c]

    # ---- per-group max, broadcast back to all 39 lanes (dense masked reductions) ----
    # Kept per-group (not per-row global) so no head can under/overflow the exp.
    m_bcast = jnp.full_like(x, _NEG)
    for g in range(NUM_ATTRS):
        in_g = gid == g                                                  # (1,39) bool
        m_g = jnp.max(jnp.where(in_g, x, _NEG), axis=-1, keepdims=True)  # (TB,1)
        m_bcast = jnp.where(in_g, m_g, m_bcast)

    z = x - m_bcast                                                      # (TB,39)
    e = jnp.exp(z)                                                       # one EUP pass, all 39 lanes

    # per-head sum(exp) via one MXU membership matmul, then log-sum-exp
    sumexp = _precise_dot(e, m_mat)                                      # (TB,12)
    lse = jnp.log(sumexp)                                                # (TB,12)

    # broadcast targets to 39 lanes via M^T (exact: one-hot weights, small-int values)
    t_bcast = jnp.dot(t.astype(jnp.float32), mt_mat,
                      preferred_element_type=jnp.float32)                # (TB,39)
    onehot = (jnp.abs(t_bcast - lane_off) < 0.5).astype(jnp.float32)     # 0 everywhere if t == -1

    # validity masks; rows past `batch` (padded remainder of the last block) are dropped here
    row0 = pl.program_id(0) * tb
    rows12 = row0 + jax.lax.broadcasted_iota(jnp.int32, (tb, NUM_ATTRS), 0)
    rows1 = row0 + jax.lax.broadcasted_iota(jnp.int32, (tb, 1), 0)
    valid = jnp.logical_and(t != -1, rows12 < batch)                     # (TB,12)
    row_ok = rows1 < batch                                               # (TB,1)

    # per-block partial sums only; the divides / final mean are deferred to the wrapper.
    # (jnp.where, not multiply, so garbage in padded rows can never poison the sums.)
    lse_sum_ref[0] = jnp.sum(jnp.where(valid, lse, 0.0), axis=0, keepdims=True)       # (1,12)
    cnt_ref[0] = jnp.sum(valid.astype(jnp.float32), axis=0, keepdims=True)            # (1,12)
    picked_ref[0] = jnp.sum(jnp.where(row_ok, onehot * z, 0.0), axis=0, keepdims=True)  # (1,39)


def attribute_loss(logits, attribute, *, block_rows=1024):
    """logits: [B, 39] f32/bf16, attribute: [B, 12] int32 (-1 = ignore). Scalar f32."""
    batch, nc = logits.shape
    assert nc == NUM_CHANNELS and attribute.shape == (batch, NUM_ATTRS)

    tb = _round_up(min(block_rows, _round_up(batch, 8)), 8)
    grid = pl.cdiv(batch, tb)

    kernel = functools.partial(_attribute_loss_kernel, batch=batch, block_rows=tb)
    lse_sum, cnt, picked_c = pl.pallas_call(
        kernel,
        grid=(grid,),
        in_specs=[
            pl.BlockSpec((tb, NUM_CHANNELS), lambda i: (i, 0)),
            pl.BlockSpec((tb, NUM_ATTRS), lambda i: (i, 0)),
        ],
        out_specs=(
            pl.BlockSpec((1, 1, NUM_ATTRS), lambda i: (i, 0, 0)),
            pl.BlockSpec((1, 1, NUM_ATTRS), lambda i: (i, 0, 0)),
            pl.BlockSpec((1, 1, NUM_CHANNELS), lambda i: (i, 0, 0)),
        ),
        out_shape=(
            jax.ShapeDtypeStruct((grid, 1, NUM_ATTRS), jnp.float32),
            jax.ShapeDtypeStruct((grid, 1, NUM_ATTRS), jnp.float32),
            jax.ShapeDtypeStruct((grid, 1, NUM_CHANNELS), jnp.float32),
        ),
        compiler_params=pltpu.CompilerParams(
            dimension_semantics=("parallel",),          # lets v7x megacore shard the batch
            vmem_limit_bytes=32 * 1024 * 1024,
        ),
    )(logits, attribute)

    # Tiny cross-block finalization (grid x (12+12+39) floats): global numerator /
    # global denominator per head, divided exactly once — correct for uneven valid
    # counts per block.  NaN if a head has zero valid samples anywhere, matching torch.
    lse_sum = jnp.sum(lse_sum, axis=(0, 1))        # (12,)
    cnt = jnp.sum(cnt, axis=(0, 1))                # (12,)
    picked_c = jnp.sum(picked_c, axis=(0, 1))      # (39,)
    picked_g = jnp.stack([jnp.sum(picked_c[s:e]) for (s, e) in GROUPS])  # (12,) exact f32 fold
    per_head = (lse_sum - picked_g) / cnt
    return jnp.mean(per_head)


def attribute_loss_ref(logits, attribute):
    """Pure-JAX reference (PyTorch CrossEntropyLoss(ignore_index=-1) semantics)."""
    logits = logits.astype(jnp.float32)
    losses = []
    for g, (s, e) in enumerate(GROUPS):
        x = logits[:, s:e]
        t = attribute[:, g]
        logp = jax.nn.log_softmax(x, axis=-1)
        safe_t = jnp.where(t == -1, 0, t)
        picked = jnp.take_along_axis(logp, safe_t[:, None], axis=-1)[:, 0]
        valid = (t != -1).astype(jnp.float32)
        losses.append(jnp.sum(-picked * valid) / jnp.sum(valid))
    return sum(losses) / len(losses)


if __name__ == "__main__":
    key = jax.random.PRNGKey(0)
    k_logits, k_attr, k_mask = jax.random.split(key, 3)

    B = 40
    logits = jax.random.normal(k_logits, (B, NUM_CHANNELS), dtype=jnp.float32)

    # class counts per head: 9 binary heads, then age(4), upcolor(8), downcolor(9)
    class_counts = jnp.array([e - s for (s, e) in GROUPS], dtype=jnp.int32)  # (12,)
    raw = jax.random.randint(k_attr, (B, NUM_ATTRS), 0, 1_000_000, dtype=jnp.int32)
    attribute = raw % class_counts[None, :]
    ignore = jax.random.bernoulli(k_mask, 0.2, (B, NUM_ATTRS))
    ignore = ignore.at[0, :].set(False)          # keep every head with >=1 valid sample
    attribute = jnp.where(ignore, -1, attribute).astype(jnp.int32)

    ref = attribute_loss_ref(logits, attribute)

    # multi-block path: grid=3, last block is a masked partial (remainder) block
    loss_tiled = attribute_loss(logits, attribute, block_rows=16)
    # single-block path: grid=1
    loss_single = attribute_loss(logits, attribute, block_rows=1024)
    jax.block_until_ready((loss_tiled, loss_single))

    assert jnp.allclose(loss_tiled, ref, rtol=1e-4, atol=1e-4), (loss_tiled, ref)
    assert jnp.allclose(loss_single, ref, rtol=1e-4, atol=1e-4), (loss_single, ref)
    print("KERNEL_OK")
</pallas_src>

<mosaic_0001>
module attributes {stable_mosaic.version = 11 : i64} {
  func.func @_attribute_loss_kernel(%arg0: i32, %arg1: memref<16x39xf32, #tpu.memory_space<vmem>>, %arg2: memref<16x12xi32, #tpu.memory_space<vmem>>, %arg3: memref<1x1x12xf32, #tpu.memory_space<vmem>>, %arg4: memref<1x1x12xf32, #tpu.memory_space<vmem>>, %arg5: memref<1x1x39xf32, #tpu.memory_space<vmem>>) attributes {dimension_semantics = [#tpu.dimension_semantics<parallel>], iteration_bounds = array<i64: 3>, scalar_prefetch = 0 : i64, scratch_operands = 0 : i64, tpu.core_type = #tpu.core_type<tc>, window_params = [{transform_indices = @transform_0, window_bounds = array<i64: 16, 39>}, {transform_indices = @transform_1, window_bounds = array<i64: 16, 12>}, {transform_indices = @transform_2, window_bounds = array<i64: 1, 1, 12>}, {transform_indices = @transform_3, window_bounds = array<i64: 1, 1, 12>}, {transform_indices = @transform_4, window_bounds = array<i64: 1, 1, 39>}]} {
    %c0 = arith.constant 0 : index
    %c0_0 = arith.constant 0 : index
    %0 = vector.load %arg1[%c0, %c0_0] : memref<16x39xf32, #tpu.memory_space<vmem>>, vector<16x39xf32>
    %c0_1 = arith.constant 0 : index
    %c0_2 = arith.constant 0 : index
    %1 = vector.load %arg2[%c0_1, %c0_2] : memref<16x12xi32, #tpu.memory_space<vmem>>, vector<16x12xi32>
    %2 = tpu.iota {dimensions = array<i32: 1>} : vector<1x39xi32>
    %c0_i32 = arith.constant 0 : i32
    %3 = vector.broadcast %c0_i32 : i32 to vector<1x39xi32>
    %c0_i32_3 = arith.constant 0 : i32
    %4 = vector.broadcast %c0_i32_3 : i32 to vector<1x39xi32>
    %c2_i32 = arith.constant 2 : i32
    %5 = vector.broadcast %c2_i32 : i32 to vector<1x39xi32>
    %6 = arith.cmpi sge, %2, %5 : vector<1x39xi32>
    %7 = arith.extui %6 : vector<1x39xi1> to vector<1x39xi32>
    %8 = arith.addi %3, %7 : vector<1x39xi32>
    %c2_i32_4 = arith.constant 2 : i32
    %9 = vector.broadcast %c2_i32_4 : i32 to vector<1x39xi32>
    %10 = arith.muli %7, %9 : vector<1x39xi32>
    %11 = arith.addi %4, %10 : vector<1x39xi32>
    %c4_i32 = arith.constant 4 : i32
    %12 = vector.broadcast %c4_i32 : i32 to vector<1x39xi32>
    %13 = arith.cmpi sge, %2, %12 : vector<1x39xi32>
    %14 = arith.extui %13 : vector<1x39xi1> to vector<1x39xi32>
    %15 = arith.addi %8, %14 : vector<1x39xi32>
    %c2_i32_5 = arith.constant 2 : i32
    %16 = vector.broadcast %c2_i32_5 : i32 to vector<1x39xi32>
    %17 = arith.muli %14, %16 : vector<1x39xi32>
    %18 = arith.addi %11, %17 : vector<1x39xi32>
    %c6_i32 = arith.constant 6 : i32
    %19 = vector.broadcast %c6_i32 : i32 to vector<1x39xi32>
    %20 = arith.cmpi sge, %2, %19 : vector<1x39xi32>
    %21 = arith.extui %20 : vector<1x39xi1> to vector<1x39xi32>
    %22 = arith.addi %15, %21 : vector<1x39xi32>
    %c2_i32_6 = arith.constant 2 : i32
    %23 = vector.broadcast %c2_i32_6 : i32 to vector<1x39xi32>
    %24 = arith.muli %21, %23 : vector<1x39xi32>
    %25 = arith.addi %18, %24 : vector<1x39xi32>
    %c8_i32 = arith.constant 8 : i32
    %26 = vector.broadcast %c8_i32 : i32 to vector<1x39xi32>
    %27 = arith.cmpi sge, %2, %26 : vector<1x39xi32>
    %28 = arith.extui %27 : vector<1x39xi1> to vector<1x39xi32>
    %29 = arith.addi %22, %28 : vector<1x39xi32>
    %c2_i32_7 = arith.constant 2 : i32
    %30 = vector.broadcast %c2_i32_7 : i32 to vector<1x39xi32>
    %31 = arith.muli %28, %30 : vector<1x39xi32>
    %32 = arith.addi %25, %31 : vector<1x39xi32>
    %c10_i32 = arith.constant 10 : i32
    %33 = vector.broadcast %c10_i32 : i32 to vector<1x39xi32>
    %34 = arith.cmpi sge, %2, %33 : vector<1x39xi32>
    %35 = arith.extui %34 : vector<1x39xi1> to vector<1x39xi32>
    %36 = arith.addi %29, %35 : vector<1x39xi32>
    %c2_i32_8 = arith.constant 2 : i32
    %37 = vector.broadcast %c2_i32_8 : i32 to vector<1x39xi32>
    %38 = arith.muli %35, %37 : vector<1x39xi32>
    %39 = arith.addi %32, %38 : vector<1x39xi32>
    %c12_i32 = arith.constant 12 : i32
    %40 = vector.broadcast %c12_i32 : i32 to vector<1x39xi32>
    %41 = arith.cmpi sge, %2, %40 : vector<1x39xi32>
    %42 = arith.extui %41 : vector<1x39xi1> to vector<1x39xi32>
    %43 = arith.addi %36, %42 : vector<1x39xi32>
    %c2_i32_9 = arith.constant 2 : i32
    %44 = vector.broadcast %c2_i32_9 : i32 to vector<1x39xi32>
    %45 = arith.muli %42, %44 : vector<1x39xi32>
    %46 = arith.addi %39, %45 : vector<1x39xi32>
    %c14_i32 = arith.constant 14 : i32
    %47 = vector.broadcast %c14_i32 : i32 to vector<1x39xi32>
    %48 = arith.cmpi sge, %2, %47 : vector<1x39xi32>
    %49 = arith.extui %48 : vector<1x39xi1> to vector<1x39xi32>
    %50 = arith.addi %43, %49 : vector<1x39xi32>
    %c2_i32_10 = arith.constant 2 : i32
    %51 = vector.broadcast %c2_i32_10 : i32 to vector<1x39xi32>
    %52 = arith.muli %49, %51 : vector<1x39xi32>
    %53 = arith.addi %46, %52 : vector<1x39xi32>
    %c16_i32 = arith.constant 16 : i32
    %54 = vector.broadcast %c16_i32 : i32 to vector<1x39xi32>
    %55 = arith.cmpi sge, %2, %54 : vector<1x39xi32>
    %56 = arith.extui %55 : vector<1x39xi1> to vector<1x39xi32>
    %57 = arith.addi %50, %56 : vector<1x39xi32>
    %c2_i32_11 = arith.constant 2 : i32
    %58 = vector.broadcast %c2_i32_11 : i32 to vector<1x39xi32>
    %59 = arith.muli %56, %58 : vector<1x39xi32>
    %60 = arith.addi %53, %59 : vector<1x39xi32>
    %c18_i32 = arith.constant 18 : i32
    %61 = vector.broadcast %c18_i32 : i32 to vector<1x39xi32>
    %62 = arith.cmpi sge, %2, %61 : vector<1x39xi32>
    %63 = arith.extui %62 : vector<1x39xi1> to vector<1x39xi32>
    %64 = arith.addi %57, %63 : vector<1x39xi32>
    %c2_i32_12 = arith.constant 2 : i32
    %65 = vector.broadcast %c2_i32_12 : i32 to vector<1x39xi32>
    %66 = arith.muli %63, %65 : vector<1x39xi32>
    %67 = arith.addi %60, %66 : vector<1x39xi32>
    %c22_i32 = arith.constant 22 : i32
    %68 = vector.broadcast %c22_i32 : i32 to vector<1x39xi32>
    %69 = arith.cmpi sge, %2, %68 : vector<1x39xi32>
    %70 = arith.extui %69 : vector<1x39xi1> to vector<1x39xi32>
    %71 = arith.addi %64, %70 : vector<1x39xi32>
    %c4_i32_13 = arith.constant 4 : i32
    %72 = vector.broadcast %c4_i32_13 : i32 to vector<1x39xi32>
    %73 = arith.muli %70, %72 : vector<1x39xi32>
    %74 = arith.addi %67, %73 : vector<1x39xi32>
    %c30_i32 = arith.constant 30 : i32
    %75 = vector.broadcast %c30_i32 : i32 to vector<1x39xi32>
    %76 = arith.cmpi sge, %2, %75 : vector<1x39xi32>
    %77 = arith.extui %76 : vector<1x39xi1> to vector<1x39xi32>
    %78 = arith.addi %71, %77 : vector<1x39xi32>
    %c8_i32_14 = arith.constant 8 : i32
    %79 = vector.broadcast %c8_i32_14 : i32 to vector<1x39xi32>
    %80 = arith.muli %77, %79 : vector<1x39xi32>
    %81 = arith.addi %74, %80 : vector<1x39xi32>
    %82 = arith.subi %2, %81 : vector<1x39xi32>
    %83 = arith.sitofp %82 : vector<1x39xi32> to vector<1x39xf32>
    %84 = tpu.iota {dimensions = array<i32: 0>} : vector<39x12xi32>
    %85 = tpu.iota {dimensions = array<i32: 1>} : vector<39x12xi32>
    %c0_i32_15 = arith.constant 0 : i32
    %86 = vector.broadcast %c0_i32_15 : i32 to vector<39x12xi32>
    %c2_i32_16 = arith.constant 2 : i32
    %87 = vector.broadcast %c2_i32_16 : i32 to vector<39x12xi32>
    %88 = arith.cmpi sge, %84, %87 : vector<39x12xi32>
    %89 = arith.extui %88 : vector<39x12xi1> to vector<39x12xi32>
    %90 = arith.addi %86, %89 : vector<39x12xi32>
    %c4_i32_17 = arith.constant 4 : i32
    %91 = vector.broadcast %c4_i32_17 : i32 to vector<39x12xi32>
    %92 = arith.cmpi sge, %84, %91 : vector<39x12xi32>
    %93 = arith.extui %92 : vector<39x12xi1> to vector<39x12xi32>
    %94 = arith.addi %90, %93 : vector<39x12xi32>
    %c6_i32_18 = arith.constant 6 : i32
    %95 = vector.broadcast %c6_i32_18 : i32 to vector<39x12xi32>
    %96 = arith.cmpi sge, %84, %95 : vector<39x12xi32>
    %97 = arith.extui %96 : vector<39x12xi1> to vector<39x12xi32>
    %98 = arith.addi %94, %97 : vector<39x12xi32>
    %c8_i32_19 = arith.constant 8 : i32
    %99 = vector.broadcast %c8_i32_19 : i32 to vector<39x12xi32>
    %100 = arith.cmpi sge, %84, %99 : vector<39x12xi32>
    %101 = arith.extui %100 : vector<39x12xi1> to vector<39x12xi32>
    %102 = arith.addi %98, %101 : vector<39x12xi32>
    %c10_i32_20 = arith.constant 10 : i32
    %103 = vector.broadcast %c10_i32_20 : i32 to vector<39x12xi32>
    %104 = arith.cmpi sge, %84, %103 : vector<39x12xi32>
    %105 = arith.extui %104 : vector<39x12xi1> to vector<39x12xi32>
    %106 = arith.addi %102, %105 : vector<39x12xi32>
    %c12_i32_21 = arith.constant 12 : i32
    %107 = vector.broadcast %c12_i32_21 : i32 to vector<39x12xi32>
    %108 = arith.cmpi sge, %84, %107 : vector<39x12xi32>
    %109 = arith.extui %108 : vector<39x12xi1> to vector<39x12xi32>
    %110 = arith.addi %106, %109 : vector<39x12xi32>
    %c14_i32_22 = arith.constant 14 : i32
    %111 = vector.broadcast %c14_i32_22 : i32 to vector<39x12xi32>
    %112 = arith.cmpi sge, %84, %111 : vector<39x12xi32>
    %113 = arith.extui %112 : vector<39x12xi1> to vector<39x12xi32>
    %114 = arith.addi %110, %113 : vector<39x12xi32>
    %c16_i32_23 = arith.constant 16 : i32
    %115 = vector.broadcast %c16_i32_23 : i32 to vector<39x12xi32>
    %116 = arith.cmpi sge, %84, %115 : vector<39x12xi32>
    %117 = arith.extui %116 : vector<39x12xi1> to vector<39x12xi32>
    %118 = arith.addi %114, %117 : vector<39x12xi32>
    %c18_i32_24 = arith.constant 18 : i32
    %119 = vector.broadcast %c18_i32_24 : i32 to vector<39x12xi32>
    %120 = arith.cmpi sge, %84, %119 : vector<39x12xi32>
    %121 = arith.extui %120 : vector<39x12xi1> to vector<39x12xi32>
    %122 = arith.addi %118, %121 : vector<39x12xi32>
    %c22_i32_25 = arith.constant 22 : i32
    %123 = vector.broadcast %c22_i32_25 : i32 to vector<39x12xi32>
    %124 = arith.cmpi sge, %84, %123 : vector<39x12xi32>
    %125 = arith.extui %124 : vector<39x12xi1> to vector<39x12xi32>
    %126 = arith.addi %122, %125 : vector<39x12xi32>
    %c30_i32_26 = arith.constant 30 : i32
    %127 = vector.broadcast %c30_i32_26 : i32 to vector<39x12xi32>
    %128 = arith.cmpi sge, %84, %127 : vector<39x12xi32>
    %129 = arith.extui %128 : vector<39x12xi1> to vector<39x12xi32>
    %130 = arith.addi %126, %129 : vector<39x12xi32>
    %131 = arith.cmpi eq, %130, %85 : vector<39x12xi32>
    %132 = arith.extui %131 : vector<39x12xi1> to vector<39x12xi32>
    %133 = arith.sitofp %132 : vector<39x12xi32> to vector<39x12xf32>
    %134 = tpu.iota {dimensions = array<i32: 0>} : vector<12x39xi32>
    %135 = tpu.iota {dimensions = array<i32: 1>} : vector<12x39xi32>
    %c0_i32_27 = arith.constant 0 : i32
    %136 = vector.broadcast %c0_i32_27 : i32 to vector<12x39xi32>
    %c2_i32_28 = arith.constant 2 : i32
    %137 = vector.broadcast %c2_i32_28 : i32 to vector<12x39xi32>
    %138 = arith.cmpi sge, %135, %137 : vector<12x39xi32>
    %139 = arith.extui %138 : vector<12x39xi1> to vector<12x39xi32>
    %140 = arith.addi %136, %139 : vector<12x39xi32>
    %c4_i32_29 = arith.constant 4 : i32
    %141 = vector.broadcast %c4_i32_29 : i32 to vector<12x39xi32>
    %142 = arith.cmpi sge, %135, %141 : vector<12x39xi32>
    %143 = arith.extui %142 : vector<12x39xi1> to vector<12x39xi32>
    %144 = arith.addi %140, %143 : vector<12x39xi32>
    %c6_i32_30 = arith.constant 6 : i32
    %145 = vector.broadcast %c6_i32_30 : i32 to vector<12x39xi32>
    %146 = arith.cmpi sge, %135, %145 : vector<12x39xi32>
    %147 = arith.extui %146 : vector<12x39xi1> to vector<12x39xi32>
    %148 = arith.addi %144, %147 : vector<12x39xi32>
    %c8_i32_31 = arith.constant 8 : i32
    %149 = vector.broadcast %c8_i32_31 : i32 to vector<12x39xi32>
    %150 = arith.cmpi sge, %135, %149 : vector<12x39xi32>
    %151 = arith.extui %150 : vector<12x39xi1> to vector<12x39xi32>
    %152 = arith.addi %148, %151 : vector<12x39xi32>
    %c10_i32_32 = arith.constant 10 : i32
    %153 = vector.broadcast %c10_i32_32 : i32 to vector<12x39xi32>
    %154 = arith.cmpi sge, %135, %153 : vector<12x39xi32>
    %155 = arith.extui %154 : vector<12x39xi1> to vector<12x39xi32>
    %156 = arith.addi %152, %155 : vector<12x39xi32>
    %c12_i32_33 = arith.constant 12 : i32
    %157 = vector.broadcast %c12_i32_33 : i32 to vector<12x39xi32>
    %158 = arith.cmpi sge, %135, %157 : vector<12x39xi32>
    %159 = arith.extui %158 : vector<12x39xi1> to vector<12x39xi32>
    %160 = arith.addi %156, %159 : vector<12x39xi32>
    %c14_i32_34 = arith.constant 14 : i32
    %161 = vector.broadcast %c14_i32_34 : i32 to vector<12x39xi32>
    %162 = arith.cmpi sge, %135, %161 : vector<12x39xi32>
    %163 = arith.extui %162 : vector<12x39xi1> to vector<12x39xi32>
    %164 = arith.addi %160, %163 : vector<12x39xi32>
    %c16_i32_35 = arith.constant 16 : i32
    %165 = vector.broadcast %c16_i32_35 : i32 to vector<12x39xi32>
    %166 = arith.cmpi sge, %135, %165 : vector<12x39xi32>
    %167 = arith.extui %166 : vector<12x39xi1> to vector<12x39xi32>
    %168 = arith.addi %164, %167 : vector<12x39xi32>
    %c18_i32_36 = arith.constant 18 : i32
    %169 = vector.broadcast %c18_i32_36 : i32 to vector<12x39xi32>
    %170 = arith.cmpi sge, %135, %169 : vector<12x39xi32>
    %171 = arith.extui %170 : vector<12x39xi1> to vector<12x39xi32>
    %172 = arith.addi %168, %171 : vector<12x39xi32>
    %c22_i32_37 = arith.constant 22 : i32
    %173 = vector.broadcast %c22_i32_37 : i32 to vector<12x39xi32>
    %174 = arith.cmpi sge, %135, %173 : vector<12x39xi32>
    %175 = arith.extui %174 : vector<12x39xi1> to vector<12x39xi32>
    %176 = arith.addi %172, %175 : vector<12x39xi32>
    %c30_i32_38 = arith.constant 30 : i32
    %177 = vector.broadcast %c30_i32_38 : i32 to vector<12x39xi32>
    %178 = arith.cmpi sge, %135, %177 : vector<12x39xi32>
    %179 = arith.extui %178 : vector<12x39xi1> to vector<12x39xi32>
    %180 = arith.addi %176, %179 : vector<12x39xi32>
    %181 = arith.cmpi eq, %180, %134 : vector<12x39xi32>
    %182 = arith.extui %181 : vector<12x39xi1> to vector<12x39xi32>
    %183 = arith.sitofp %182 : vector<12x39xi32> to vector<12x39xf32>
    %cst = arith.constant -1.000000e+30 : f32
    %184 = vector.broadcast %cst : f32 to vector<16x39xf32>
    %c0_i32_39 = arith.constant 0 : i32
    %185 = vector.broadcast %c0_i32_39 : i32 to vector<1x39xi32>
    %186 = arith.cmpi eq, %78, %185 : vector<1x39xi32>
    %cst_40 = arith.constant -1.000000e+30 : f32
    %187 = vector.shape_cast %186 : vector<1x39xi1> to vector<1x39xi1>
    %188 = vector.broadcast %187 : vector<1x39xi1> to vector<16x39xi1>
    %189 = vector.broadcast %cst_40 : f32 to vector<16x39xf32>
    %190 = arith.select %188, %0, %189 : vector<16x39xi1>, vector<16x39xf32>
    %cst_41 = arith.constant dense<0xFF800000> : vector<16xf32>
    %191 = vector.multi_reduction <maximumf>, %190, %cst_41 [1] : vector<16x39xf32> to vector<16xf32>
    %192 = vector.shape_cast %191 : vector<16xf32> to vector<16x1xf32>
    %193 = vector.shape_cast %186 : vector<1x39xi1> to vector<1x39xi1>
    %194 = vector.broadcast %193 : vector<1x39xi1> to vector<16x39xi1>
    %195 = vector.shape_cast %192 : vector<16x1xf32> to vector<16x1xf32>
    %196 = vector.broadcast %195 : vector<16x1xf32> to vector<16x39xf32>
    %197 = arith.select %194, %196, %184 : vector<16x39xi1>, vector<16x39xf32>
    %c1_i32 = arith.constant 1 : i32
    %198 = vector.broadcast %c1_i32 : i32 to vector<1x39xi32>
    %199 = arith.cmpi eq, %78, %198 : vector<1x39xi32>
    %cst_42 = arith.constant -1.000000e+30 : f32
    %200 = vector.shape_cast %199 : vector<1x39xi1> to vector<1x39xi1>
    %201 = vector.broadcast %200 : vector<1x39xi1> to vector<16x39xi1>
    %202 = vector.broadcast %cst_42 : f32 to vector<16x39xf32>
    %203 = arith.select %201, %0, %202 : vector<16x39xi1>, vector<16x39xf32>
    %cst_43 = arith.constant dense<0xFF800000> : vector<16xf32>
    %204 = vector.multi_reduction <maximumf>, %203, %cst_43 [1] : vector<16x39xf32> to vector<16xf32>
    %205 = vector.shape_cast %204 : vector<16xf32> to vector<16x1xf32>
    %206 = vector.shape_cast %199 : vector<1x39xi1> to vector<1x39xi1>
    %207 = vector.broadcast %206 : vector<1x39xi1> to vector<16x39xi1>
    %208 = vector.shape_cast %205 : vector<16x1xf32> to vector<16x1xf32>
    %209 = vector.broadcast %208 : vector<16x1xf32> to vector<16x39xf32>
    %210 = arith.select %207, %209, %197 : vector<16x39xi1>, vector<16x39xf32>
    %c2_i32_44 = arith.constant 2 : i32
    %211 = vector.broadcast %c2_i32_44 : i32 to vector<1x39xi32>
    %212 = arith.cmpi eq, %78, %211 : vector<1x39xi32>
    %cst_45 = arith.constant -1.000000e+30 : f32
    %213 = vector.shape_cast %212 : vector<1x39xi1> to vector<1x39xi1>
    %214 = vector.broadcast %213 : vector<1x39xi1> to vector<16x39xi1>
    %215 = vector.broadcast %cst_45 : f32 to vector<16x39xf32>
    %216 = arith.select %214, %0, %215 : vector<16x39xi1>, vector<16x39xf32>
    %cst_46 = arith.constant dense<0xFF800000> : vector<16xf32>
    %217 = vector.multi_reduction <maximumf>, %216, %cst_46 [1] : vector<16x39xf32> to vector<16xf32>
    %218 = vector.shape_cast %217 : vector<16xf32> to vector<16x1xf32>
    %219 = vector.shape_cast %212 : vector<1x39xi1> to vector<1x39xi1>
    %220 = vector.broadcast %219 : vector<1x39xi1> to vector<16x39xi1>
    %221 = vector.shape_cast %218 : vector<16x1xf32> to vector<16x1xf32>
    %222 = vector.broadcast %221 : vector<16x1xf32> to vector<16x39xf32>
    %223 = arith.select %220, %222, %210 : vector<16x39xi1>, vector<16x39xf32>
    %c3_i32 = arith.constant 3 : i32
    %224 = vector.broadcast %c3_i32 : i32 to vector<1x39xi32>
    %225 = arith.cmpi eq, %78, %224 : vector<1x39xi32>
    %cst_47 = arith.constant -1.000000e+30 : f32
    %226 = vector.shape_cast %225 : vector<1x39xi1> to vector<1x39xi1>
    %227 = vector.broadcast %226 : vector<1x39xi1> to vector<16x39xi1>
    %228 = vector.broadcast %cst_47 : f32 to vector<16x39xf32>
    %229 = arith.select %227, %0, %228 : vector<16x39xi1>, vector<16x39xf32>
    %cst_48 = arith.constant dense<0xFF800000> : vector<16xf32>
    %230 = vector.multi_reduction <maximumf>, %229, %cst_48 [1] : vector<16x39xf32> to vector<16xf32>
    %231 = vector.shape_cast %230 : vector<16xf32> to vector<16x1xf32>
    %232 = vector.shape_cast %225 : vector<1x39xi1> to vector<1x39xi1>
    %233 = vector.broadcast %232 : vector<1x39xi1> to vector<16x39xi1>
    %234 = vector.shape_cast %231 : vector<16x1xf32> to vector<16x1xf32>
    %235 = vector.broadcast %234 : vector<16x1xf32> to vector<16x39xf32>
    %236 = arith.select %233, %235, %223 : vector<16x39xi1>, vector<16x39xf32>
    %c4_i32_49 = arith.constant 4 : i32
    %237 = vector.broadcast %c4_i32_49 : i32 to vector<1x39xi32>
    %238 = arith.cmpi eq, %78, %237 : vector<1x39xi32>
    %cst_50 = arith.constant -1.000000e+30 : f32
    %239 = vector.shape_cast %238 : vector<1x39xi1> to vector<1x39xi1>
    %240 = vector.broadcast %239 : vector<1x39xi1> to vector<16x39xi1>
    %241 = vector.broadcast %cst_50 : f32 to vector<16x39xf32>
    %242 = arith.select %240, %0, %241 : vector<16x39xi1>, vector<16x39xf32>
    %cst_51 = arith.constant dense<0xFF800000> : vector<16xf32>
    %243 = vector.multi_reduction <maximumf>, %242, %cst_51 [1] : vector<16x39xf32> to vector<16xf32>
    %244 = vector.shape_cast %243 : vector<16xf32> to vector<16x1xf32>
    %245 = vector.shape_cast %238 : vector<1x39xi1> to vector<1x39xi1>
    %246 = vector.broadcast %245 : vector<1x39xi1> to vector<16x39xi1>
    %247 = vector.shape_cast %244 : vector<16x1xf32> to vector<16x1xf32>
    %248 = vector.broadcast %247 : vector<16x1xf32> to vector<16x39xf32>
    %249 = arith.select %246, %248, %236 : vector<16x39xi1>, vector<16x39xf32>
    %c5_i32 = arith.constant 5 : i32
    %250 = vector.broadcast %c5_i32 : i32 to vector<1x39xi32>
    %251 = arith.cmpi eq, %78, %250 : vector<1x39xi32>
    %cst_52 = arith.constant -1.000000e+30 : f32
    %252 = vector.shape_cast %251 : vector<1x39xi1> to vector<1x39xi1>
    %253 = vector.broadcast %252 : vector<1x39xi1> to vector<16x39xi1>
    %254 = vector.broadcast %cst_52 : f32 to vector<16x39xf32>
    %255 = arith.select %253, %0, %254 : vector<16x39xi1>, vector<16x39xf32>
    %cst_53 = arith.constant dense<0xFF800000> : vector<16xf32>
    %256 = vector.multi_reduction <maximumf>, %255, %cst_53 [1] : vector<16x39xf32> to vector<16xf32>
    %257 = vector.shape_cast %256 : vector<16xf32> to vector<16x1xf32>
    %258 = vector.shape_cast %251 : vector<1x39xi1> to vector<1x39xi1>
    %259 = vector.broadcast %258 : vector<1x39xi1> to vector<16x39xi1>
    %260 = vector.shape_cast %257 : vector<16x1xf32> to vector<16x1xf32>
    %261 = vector.broadcast %260 : vector<16x1xf32> to vector<16x39xf32>
    %262 = arith.select %259, %261, %249 : vector<16x39xi1>, vector<16x39xf32>
    %c6_i32_54 = arith.constant 6 : i32
    %263 = vector.broadcast %c6_i32_54 : i32 to vector<1x39xi32>
    %264 = arith.cmpi eq, %78, %263 : vector<1x39xi32>
    %cst_55 = arith.constant -1.000000e+30 : f32
    %265 = vector.shape_cast %264 : vector<1x39xi1> to vector<1x39xi1>
    %266 = vector.broadcast %265 : vector<1x39xi1> to vector<16x39xi1>
    %267 = vector.broadcast %cst_55 : f32 to vector<16x39xf32>
    %268 = arith.select %266, %0, %267 : vector<16x39xi1>, vector<16x39xf32>
    %cst_56 = arith.constant dense<0xFF800000> : vector<16xf32>
    %269 = vector.multi_reduction <maximumf>, %268, %cst_56 [1] : vector<16x39xf32> to vector<16xf32>
    %270 = vector.shape_cast %269 : vector<16xf32> to vector<16x1xf32>
    %271 = vector.shape_cast %264 : vector<1x39xi1> to vector<1x39xi1>
    %272 = vector.broadcast %271 : vector<1x39xi1> to vector<16x39xi1>
    %273 = vector.shape_cast %270 : vector<16x1xf32> to vector<16x1xf32>
    %274 = vector.broadcast %273 : vector<16x1xf32> to vector<16x39xf32>
    %275 = arith.select %272, %274, %262 : vector<16x39xi1>, vector<16x39xf32>
    %c7_i32 = arith.constant 7 : i32
    %276 = vector.broadcast %c7_i32 : i32 to vector<1x39xi32>
    %277 = arith.cmpi eq, %78, %276 : vector<1x39xi32>
    %cst_57 = arith.constant -1.000000e+30 : f32
    %278 = vector.shape_cast %277 : vector<1x39xi1> to vector<1x39xi1>
    %279 = vector.broadcast %278 : vector<1x39xi1> to vector<16x39xi1>
    %280 = vector.broadcast %cst_57 : f32 to vector<16x39xf32>
    %281 = arith.select %279, %0, %280 : vector<16x39xi1>, vector<16x39xf32>
    %cst_58 = arith.constant dense<0xFF800000> : vector<16xf32>
    %282 = vector.multi_reduction <maximumf>, %281, %cst_58 [1] : vector<16x39xf32> to vector<16xf32>
    %283 = vector.shape_cast %282 : vector<16xf32> to vector<16x1xf32>
    %284 = vector.shape_cast %277 : vector<1x39xi1> to vector<1x39xi1>
    %285 = vector.broadcast %284 : vector<1x39xi1> to vector<16x39xi1>
    %286 = vector.shape_cast %283 : vector<16x1xf32> to vector<16x1xf32>
    %287 = vector.broadcast %286 : vector<16x1xf32> to vector<16x39xf32>
    %288 = arith.select %285, %287, %275 : vector<16x39xi1>, vector<16x39xf32>
    %c8_i32_59 = arith.constant 8 : i32
    %289 = vector.broadcast %c8_i32_59 : i32 to vector<1x39xi32>
    %290 = arith.cmpi eq, %78, %289 : vector<1x39xi32>
    %cst_60 = arith.constant -1.000000e+30 : f32
    %291 = vector.shape_cast %290 : vector<1x39xi1> to vector<1x39xi1>
    %292 = vector.broadcast %291 : vector<1x39xi1> to vector<16x39xi1>
    %293 = vector.broadcast %cst_60 : f32 to vector<16x39xf32>
    %294 = arith.select %292, %0, %293 : vector<16x39xi1>, vector<16x39xf32>
    %cst_61 = arith.constant dense<0xFF800000> : vector<16xf32>
    %295 = vector.multi_reduction <maximumf>, %294, %cst_61 [1] : vector<16x39xf32> to vector<16xf32>
    %296 = vector.shape_cast %295 : vector<16xf32> to vector<16x1xf32>
    %297 = vector.shape_cast %290 : vector<1x39xi1> to vector<1x39xi1>
    %298 = vector.broadcast %297 : vector<1x39xi1> to vector<16x39xi1>
    %299 = vector.shape_cast %296 : vector<16x1xf32> to vector<16x1xf32>
    %300 = vector.broadcast %299 : vector<16x1xf32> to vector<16x39xf32>
    %301 = arith.select %298, %300, %288 : vector<16x39xi1>, vector<16x39xf32>
    %c9_i32 = arith.constant 9 : i32
    %302 = vector.broadcast %c9_i32 : i32 to vector<1x39xi32>
    %303 = arith.cmpi eq, %78, %302 : vector<1x39xi32>
    %cst_62 = arith.constant -1.000000e+30 : f32
    %304 = vector.shape_cast %303 : vector<1x39xi1> to vector<1x39xi1>
    %305 = vector.broadcast %304 : vector<1x39xi1> to vector<16x39xi1>
    %306 = vector.broadcast %cst_62 : f32 to vector<16x39xf32>
    %307 = arith.select %305, %0, %306 : vector<16x39xi1>, vector<16x39xf32>
    %cst_63 = arith.constant dense<0xFF800000> : vector<16xf32>
    %308 = vector.multi_reduction <maximumf>, %307, %cst_63 [1] : vector<16x39xf32> to vector<16xf32>
    %309 = vector.shape_cast %308 : vector<16xf32> to vector<16x1xf32>
    %310 = vector.shape_cast %303 : vector<1x39xi1> to vector<1x39xi1>
    %311 = vector.broadcast %310 : vector<1x39xi1> to vector<16x39xi1>
    %312 = vector.shape_cast %309 : vector<16x1xf32> to vector<16x1xf32>
    %313 = vector.broadcast %312 : vector<16x1xf32> to vector<16x39xf32>
    %314 = arith.select %311, %313, %301 : vector<16x39xi1>, vector<16x39xf32>
    %c10_i32_64 = arith.constant 10 : i32
    %315 = vector.broadcast %c10_i32_64 : i32 to vector<1x39xi32>
    %316 = arith.cmpi eq, %78, %315 : vector<1x39xi32>
    %cst_65 = arith.constant -1.000000e+30 : f32
    %317 = vector.shape_cast %316 : vector<1x39xi1> to vector<1x39xi1>
    %318 = vector.broadcast %317 : vector<1x39xi1> to vector<16x39xi1>
    %319 = vector.broadcast %cst_65 : f32 to vector<16x39xf32>
    %320 = arith.select %318, %0, %319 : vector<16x39xi1>, vector<16x39xf32>
    %cst_66 = arith.constant dense<0xFF800000> : vector<16xf32>
    %321 = vector.multi_reduction <maximumf>, %320, %cst_66 [1] : vector<16x39xf32> to vector<16xf32>
    %322 = vector.shape_cast %321 : vector<16xf32> to vector<16x1xf32>
    %323 = vector.shape_cast %316 : vector<1x39xi1> to vector<1x39xi1>
    %324 = vector.broadcast %323 : vector<1x39xi1> to vector<16x39xi1>
    %325 = vector.shape_cast %322 : vector<16x1xf32> to vector<16x1xf32>
    %326 = vector.broadcast %325 : vector<16x1xf32> to vector<16x39xf32>
    %327 = arith.select %324, %326, %314 : vector<16x39xi1>, vector<16x39xf32>
    %c11_i32 = arith.constant 11 : i32
    %328 = vector.broadcast %c11_i32 : i32 to vector<1x39xi32>
    %329 = arith.cmpi eq, %78, %328 : vector<1x39xi32>
    %cst_67 = arith.constant -1.000000e+30 : f32
    %330 = vector.shape_cast %329 : vector<1x39xi1> to vector<1x39xi1>
    %331 = vector.broadcast %330 : vector<1x39xi1> to vector<16x39xi1>
    %332 = vector.broadcast %cst_67 : f32 to vector<16x39xf32>
    %333 = arith.select %331, %0, %332 : vector<16x39xi1>, vector<16x39xf32>
    %cst_68 = arith.constant dense<0xFF800000> : vector<16xf32>
    %334 = vector.multi_reduction <maximumf>, %333, %cst_68 [1] : vector<16x39xf32> to vector<16xf32>
    %335 = vector.shape_cast %334 : vector<16xf32> to vector<16x1xf32>
    %336 = vector.shape_cast %329 : vector<1x39xi1> to vector<1x39xi1>
    %337 = vector.broadcast %336 : vector<1x39xi1> to vector<16x39xi1>
    %338 = vector.shape_cast %335 : vector<16x1xf32> to vector<16x1xf32>
    %339 = vector.broadcast %338 : vector<16x1xf32> to vector<16x39xf32>
    %340 = arith.select %337, %339, %327 : vector<16x39xi1>, vector<16x39xf32>
    %341 = arith.subf %0, %340 : vector<16x39xf32>
    %342 = math.exp %341 : vector<16x39xf32>
    %343 = arith.truncf %342 : vector<16x39xf32> to vector<16x39xbf16>
    %344 = arith.extf %343 : vector<16x39xbf16> to vector<16x39xf32>
    %345 = arith.subf %342, %344 : vector<16x39xf32>
    %cst_69 = arith.constant dense<0.000000e+00> : vector<16x12xf32>
    %346 = tpu.matmul %344, %133, %cst_69 {dimension_numbers = #tpu.dot_dimension_numbers<[1], [0], [0], [1], [0, 0, 1, 1], [], []>} : vector<16x39xf32>, vector<39x12xf32>, vector<16x12xf32> -> vector<16x12xf32>
    %cst_70 = arith.constant dense<0.000000e+00> : vector<16x12xf32>
    %347 = tpu.matmul %345, %133, %cst_70 {dimension_numbers = #tpu.dot_dimension_numbers<[1], [0], [0], [1], [0, 0, 1, 1], [], []>} : vector<16x39xf32>, vector<39x12xf32>, vector<16x12xf32> -> vector<16x12xf32>
    %348 = arith.addf %346, %347 : vector<16x12xf32>
    %349 = math.log %348 : vector<16x12xf32>
    %350 = arith.sitofp %1 : vector<16x12xi32> to vector<16x12xf32>
    %cst_71 = arith.constant dense<0.000000e+00> : vector<16x39xf32>
    %351 = tpu.matmul %350, %183, %cst_71 {dimension_numbers = #tpu.dot_dimension_numbers<[1], [0], [0], [1], [0, 0, 1, 1], [], []>} : vector<16x12xf32>, vector<12x39xf32>, vector<16x39xf32> -> vector<16x39xf32>
    %352 = vector.broadcast %83 : vector<1x39xf32> to vector<16x39xf32>
    %353 = arith.subf %351, %352 : vector<16x39xf32>
    %354 = math.absf %353 : vector<16x39xf32>
    %cst_72 = arith.constant 5.000000e-01 : f32
    %355 = vector.broadcast %cst_72 : f32 to vector<16x39xf32>
    %356 = arith.cmpf olt, %354, %355 : vector<16x39xf32>
    %357 = arith.extui %356 : vector<16x39xi1> to vector<16x39xi32>
    %358 = arith.sitofp %357 : vector<16x39xi32> to vector<16x39xf32>
    %c16_i32_73 = arith.constant 16 : i32
    %359 = arith.muli %arg0, %c16_i32_73 : i32
    %360 = tpu.iota {dimensions = array<i32: 0>} : vector<16x12xi32>
    %361 = vector.broadcast %359 : i32 to vector<16x12xi32>
    %362 = arith.addi %361, %360 : vector<16x12xi32>
    %363 = tpu.iota {dimensions = array<i32: 0>} : vector<16x1xi32>
    %364 = vector.broadcast %359 : i32 to vector<16x1xi32>
    %365 = arith.addi %364, %363 : vector<16x1xi32>
    %c-1_i32 = arith.constant -1 : i32
    %366 = vector.broadcast %c-1_i32 : i32 to vector<16x12xi32>
    %367 = arith.cmpi ne, %1, %366 : vector<16x12xi32>
    %c40_i32 = arith.constant 40 : i32
    %368 = vector.broadcast %c40_i32 : i32 to vector<16x12xi32>
    %369 = arith.cmpi slt, %362, %368 : vector<16x12xi32>
    %370 = arith.andi %367, %369 : vector<16x12xi1>
    %c40_i32_74 = arith.constant 40 : i32
    %371 = vector.broadcast %c40_i32_74 : i32 to vector<16x1xi32>
    %372 = arith.cmpi slt, %365, %371 : vector<16x1xi32>
    %cst_75 = arith.constant 0.000000e+00 : f32
    %373 = vector.broadcast %cst_75 : f32 to vector<16x12xf32>
    %374 = arith.select %370, %349, %373 : vector<16x12xi1>, vector<16x12xf32>
    %cst_76 = arith.constant dense<0.000000e+00> : vector<12xf32>
    %375 = vector.multi_reduction <add>, %374, %cst_76 [0] : vector<16x12xf32> to vector<12xf32>
    %376 = vector.shape_cast %375 : vector<12xf32> to vector<1x12xf32>
    %c0_77 = arith.constant 0 : index
    %c0_78 = arith.constant 0 : index
    %c0_79 = arith.constant 0 : index
    %377 = vector.load %arg3[%c0_77, %c0_78, %c0_79] : memref<1x1x12xf32, #tpu.memory_space<vmem>>, vector<1x1x12xf32>
    %378 = vector.shape_cast %377 : vector<1x1x12xf32> to vector<1x12xf32>
    %379 = vector.shape_cast %376 : vector<1x12xf32> to vector<1x1x12xf32>
    tpu.vector_store %arg3[%c0_77, %c0_78, %c0_79], %379 {strides = array<i32>} : memref<1x1x12xf32, #tpu.memory_space<vmem>>, vector<1x1x12xf32>,
    %380 = arith.extui %370 : vector<16x12xi1> to vector<16x12xi32>
    %381 = arith.sitofp %380 : vector<16x12xi32> to vector<16x12xf32>
    %cst_80 = arith.constant dense<0.000000e+00> : vector<12xf32>
    %382 = vector.multi_reduction <add>, %381, %cst_80 [0] : vector<16x12xf32> to vector<12xf32>
    %383 = vector.shape_cast %382 : vector<12xf32> to vector<1x12xf32>
    %c0_81 = arith.constant 0 : index
    %c0_82 = arith.constant 0 : index
    %c0_83 = arith.constant 0 : index
    %384 = vector.load %arg4[%c0_81, %c0_82, %c0_83] : memref<1x1x12xf32, #tpu.memory_space<vmem>>, vector<1x1x12xf32>
    %385 = vector.shape_cast %384 : vector<1x1x12xf32> to vector<1x12xf32>
    %386 = vector.shape_cast %383 : vector<1x12xf32> to vector<1x1x12xf32>
    tpu.vector_store %arg4[%c0_81, %c0_82, %c0_83], %386 {strides = array<i32>} : memref<1x1x12xf32, #tpu.memory_space<vmem>>, vector<1x1x12xf32>,
    %387 = arith.mulf %358, %341 : vector<16x39xf32>
    %cst_84 = arith.constant 0.000000e+00 : f32
    %388 = vector.shape_cast %372 : vector<16x1xi1> to vector<16x1xi1>
    %389 = vector.broadcast %388 : vector<16x1xi1> to vector<16x39xi1>
    %390 = vector.broadcast %cst_84 : f32 to vector<16x39xf32>
    %391 = arith.select %389, %387, %390 : vector<16x39xi1>, vector<16x39xf32>
    %cst_85 = arith.constant dense<0.000000e+00> : vector<39xf32>
    %392 = vector.multi_reduction <add>, %391, %cst_85 [0] : vector<16x39xf32> to vector<39xf32>
    %393 = vector.shape_cast %392 : vector<39xf32> to vector<1x39xf32>
    %c0_86 = arith.constant 0 : index
    %c0_87 = arith.constant 0 : index
    %c0_88 = arith.constant 0 : index
    %394 = vector.load %arg5[%c0_86, %c0_87, %c0_88] : memref<1x1x39xf32, #tpu.memory_space<vmem>>, vector<1x1x39xf32>
    %395 = vector.shape_cast %394 : vector<1x1x39xf32> to vector<1x39xf32>
    %396 = vector.shape_cast %393 : vector<1x39xf32> to vector<1x1x39xf32>
    tpu.vector_store %arg5[%c0_86, %c0_87, %c0_88], %396 {strides = array<i32>} : memref<1x1x39xf32, #tpu.memory_space<vmem>>, vector<1x1x39xf32>,
    return
  }
  func.func @transform_0(%arg0: i32) -> (i32, i32) {
    %c0_i32 = arith.constant 0 : i32
    %c0_i32_0 = arith.constant 0 : i32
    return %arg0, %c0_i32 : i32, i32
  }
  func.func @transform_1(%arg0: i32) -> (i32, i32) {
    %c0_i32 = arith.constant 0 : i32
    %c0_i32_0 = arith.constant 0 : i32
    return %arg0, %c0_i32 : i32, i32
  }
  func.func @transform_2(%arg0: i32) -> (i32, i32, i32) {
    %c0_i32 = arith.constant 0 : i32
    %c0_i32_0 = arith.constant 0 : i32
    %c0_i32_1 = arith.constant 0 : i32
    return %arg0, %c0_i32, %c0_i32_0 : i32, i32, i32
  }
  func.func @transform_3(%arg0: i32) -> (i32, i32, i32) {
    %c0_i32 = arith.constant 0 : i32
    %c0_i32_0 = arith.constant 0 : i32
    %c0_i32_1 = arith.constant 0 : i32
    return %arg0, %c0_i32, %c0_i32_0 : i32, i32, i32
  }
  func.func @transform_4(%arg0: i32) -> (i32, i32, i32) {
    %c0_i32 = arith.constant 0 : i32
    %c0_i32_0 = arith.constant 0 : i32
    %c0_i32_1 = arith.constant 0 : i32
    return %arg0, %c0_i32, %c0_i32_0 : i32, i32, i32
  }
}

</mosaic_0001>

<bundles_post_ra>
// kernel: tpu_custom_call.1
= control target key start
LH: loop header
LB: loop body
LE: loop exit
PB: predicated region body
PF: predicated region fallthrough
CT: control target
= control target key end

     0   :  { %10 = vsyncpa [#allocation3], 0  ;;  %s2046_s0 = inlined_call_operand.vmem [shape: f32[40,39], index: 0, kind: input, shape index: {}]   ;;  %s2047_s1 = inlined_call_operand.vmem [shape: s32[40,12], index: 1, kind: input, shape index: {}]   ;;  %s2048_s2 = inlined_call_operand.hbm [shape: f32[3,1,12], index: 2, kind: output, shape index: {0}]   ;;  %s2049_s3 = inlined_call_operand.hbm [shape: f32[3,1,12], index: 3, kind: output, shape index: {1}]   ;;  %s2050_s4 = inlined_call_operand.hbm [shape: f32[3,1,39], index: 4, kind: output, shape index: {2}]  }
   0x1   :  { %12 = vsyncpa [#allocation3 + $0x1], 0 }
   0x2   :  { %13 = vsyncpa [#allocation5], 0 }
   0x3   :  { %15 = vsyncpa [#allocation5 + $0x1], 0  ;;  %s1518_s15 = smov 0   ;;  %s1520_s16 = smov 0  }
   0x4   :  { %s1522_s17 = smov 0   ;;  %s1524_s18 = smov 0  }
   0x5 LB: > { %s1539_s19 = sadd.s32 4294967295, %s1484_s18   ;;  %s1182_s20 = sadd.s32 4294967294, %s1484_s18   ;;  %s1484_s18 = sphi %s1524_s18, %s2084_s18   ;;  %s1480_s17 = sphi %s1522_s17, %s2083_s17   ;;  %s1476_s16 = sphi %s1520_s16, %s2082_s16   ;;  %s1472_s15 = sphi %s1518_s15, %s2081_s15  }
   0x6   : > { %s1543_s21 = sadd.s32 1, %s1484_s18   ;;  %s80_s22 = sadd.s32 1, %s1480_s17 }
   0x7   : > { %s77_s23 = ssub.s32 %s1484_s18, %s1543_s21  ;;  %p90_p0 = scmp.ne.s32.totalorder %s1480_s17, %s1476_s16 }
   0x8   : > { %p78_p1 = scmp.eq.s32.totalorder %s77_s23, 0  ;;  %p91_p2 = scmp.eq.s32.totalorder %s1539_s19, 2 }
   0x9   : > { %p96_p3 = scmp.ne.s32.totalorder %s1476_s16, %s1472_s15  ;;  %p97_p4 = scmp.eq.s32.totalorder %s1182_s20, 2 }
   0xa   : > { %s1556_s24 = scalar_select %p78_p1, %s1480_s17, %s80_s22  }
   0xb   : > { %p1558_p5 = por %p91_p2, %p90_p0  ;;  %p1562_p6 = por %p97_p4, %p96_p3 }
   0xc   : > { %p1185_p7 = scmp.ge.s32.totalorder %s1484_s18, 1  ;;  %p201_p8 = scmp.lt.s32.totalorder %s1484_s18, 4 }
   0xe   : > { %p202_p9 = pnand %p1185_p7, %p201_p8 }
   0xf   : > { %v279_v0 = vlaneseq (!%p202_p9)  ;;  %v1486_v2 = vmov (!%p202_p9), 0   ;;  %s1186_s27 = sshll.u32 (!%p202_p9), %s1539_s19, 1  ;;  %vm2052_vm11 = vcmask (!%p202_p9), 318464   ;;  %s1863_s9 = sshll.u32 (!%p202_p9), %s1539_s19, 4 }
  0x10   : > { %205 = sbr.rel (%p202_p9) target bundleno = 533 (0x215), region = 28  ;;  %p252_p10 = scmp.lt.s32.totalorder (!%p202_p9), %s1186_s27, 4 }
  0x11   : > { %v1569_v1 = vand.u32 (!%p202_p9), 127, %v279_v0  ;;  %s1895_s10 = sand.u32 (!%p202_p9), 1, %s1476_s16   ;;  %s1019_s11 = sand.u32 (!%p202_p9), 1, %s1539_s19  }
  0x12   : > { %s240_s12 = scalar_lea.vmem (!%p202_p9), [#allocation4], %s1895_s10  ;;  %s1903_s23 = scalar_lea.hbm (!%p202_p9), %s2049_s3, %s1863_s9 }
  0x13   : > { %vm281_vm0 = vcmp.ge.s32.totalorder (!%p202_p9), %v1569_v1, 2  ;;  %vm284_vm1 = vcmp.ge.s32.totalorder (!%p202_p9), %v1569_v1, 4  ;;  %vm289_vm2 = vcmp.ge.s32.totalorder (!%p202_p9), %v1569_v1, 6  ;;  %vm294_vm3 = vcmp.ge.s32.totalorder (!%p202_p9), %v1569_v1, 8  ;;  %s1049_s13 = sshll.u32 (!%p202_p9), %s240_s12, 4  ;;  %s1905_s13 = int_to_ptr.vmem [resolvable:$true] %s1049_s13 }
  0x14   : > { %v1576_v3 = vsel (!%p202_p9), %vm281_vm0, 1, %v1486_v2  ;;  %v1579_v4 = vsel (!%p202_p9), %vm284_vm1, 1, %v1486_v2  ;;  %v1582_v5 = vsel (!%p202_p9), %vm289_vm2, 1, %v1486_v2  ;;  %vm299_vm4 = vcmp.ge.s32.totalorder (!%p202_p9), %v1569_v1, 10  ;;  %s1362_s19 = scalar_lea.vmem (!%p202_p9), %s1905_s13, 16 }
  0x15   : > { %v286_v6 = vadd.s32 (!%p202_p9), %v1579_v4, %v1576_v3  ;;  %v1589_v7 = vsel (!%p202_p9), %vm294_vm3, 1, %v1486_v2  ;;  %vm304_vm5 = vcmp.ge.s32.totalorder (!%p202_p9), %v1569_v1, 12  ;;  %v1594_v9 = vsel (!%p202_p9), %vm299_vm4, 1, %v1486_v2  ;;  %p1363_p11 = scmp.ne.s32.totalorder (!%p202_p9), %s1905_s13, %s1362_s19 }
  0x16   : > { %vm309_vm6 = vcmp.ge.s32.totalorder (!%p202_p9), %v1569_v1, 14  ;;  %v1599_v11 = vsel (!%p202_p9), %vm304_vm5, 1, %v1486_v2  ;;  %vm314_vm7 = vcmp.ge.s32.totalorder (!%p202_p9), %v1569_v1, 16  ;;  %vm319_vm8 = vcmp.ge.s32.totalorder (!%p202_p9), %v1569_v1, 18 }
  0x17   : > { %v291_v8 = vadd.s32 %v1582_v5, %v286_v6  ;;  %v1604_v13 = vsel %vm309_vm6, 1, %v1486_v2  ;;  %s2086_s27 = smov (!%p252_p10, %s1186_s27), 4  ;;  %v1611_v15 = vsel %vm314_vm7, 1, %v1486_v2  ;;  %vm324_vm9 = vcmp.ge.s32.totalorder %v1569_v1, 22  ;;  %p1364_p12 = pnand %p1363_p11, %p1558_p5 }
  0x18   : > { %v1616_v17 = vsel %vm319_vm8, 1, %v1486_v2  ;;  %s1187_s28 = sshll.u32 %s2086_s27, 3  ;;  %vm329_vm10 = vcmp.ge.s32.totalorder %v1569_v1, 30  ;;  %v1622_v19 = vsel %vm324_vm9, 1, %v1486_v2  ;;  %s1908_s27 = scalar_lea.sflag [#allocation5], %s1019_s11 }
  0x19   : > { %v296_v10 = vadd.s32 %v1589_v7, %v291_v8  ;;  %s255_s5 = scalar_lea.vmem %s2046_s0, %s1187_s28  ;;  %v1631_v21 = vsel %vm329_vm10, 1, %v1486_v2  ;;  %s269_s8 = scalar_lea.vmem %s2047_s1, %s1187_s28 }
  0x1a   : > { %v1634_v23 = vld [vmem:[%s255_s5] sm:$0xff]  ;;  %v1639_v25 = vld [vmem:[%s255_s5 + $0x8] sm:$0xff]  ;;  %p1365_p13 = pneg %p1364_p12  ;;  %s1490_s28 = smov [#allocation4]  }
  0x1b   : > { %v301_v12 = vadd.s32 %v1594_v9, %v296_v10  ;;  %s1366_s29 = sshll.u32 %s1490_s28, 4  ;;  %s1367_s29 = int_to_ptr.vmem [resolvable:$false] %s1366_s29 }
  0x1c   : > { %s1368_s30 = scalar_lea.vmem %s1367_s29, 32  ;;  %p1369_p0 = scmp.lt.s32.totalorder %s1905_s13, %s1367_s29 }
  0x1d   : > { %v306_v14 = vadd.s32 %v1599_v11, %v301_v12  ;;  %p1370_p1 = scmp.lt.s32.totalorder %s1368_s30, %s1362_s19 }
  0x1f   : > { %v311_v16 = vadd.s32 %v1604_v13, %v306_v14  ;;  %p1371_p2 = por %p1370_p1, %p1369_p0 }
  0x21   : > { %v316_v18 = vadd.s32 %v1611_v15, %v311_v16  ;;  %p1372_p3 = pnand %p1371_p2, %p1365_p13 }
  0x23   : > { %v321_v20 = vadd.s32 %v1616_v17, %v316_v18 }
  0x25   : > { %v326_v22 = vadd.s32 %v1622_v19, %v321_v20 }
  0x27   : > { %v1637_v24 = vadd.s32 %v1631_v21, %v326_v22 }
  0x29   : > { %vm537_vm12 = vcmp.eq.s32.totalorder %v1637_v24, 1  ;;  %vm523_vm13 = vcmp.eq.s32.totalorder %v1637_v24, 0  ;;  %vm550_vm14 = vcmp.eq.s32.totalorder %v1637_v24, 2  ;;  %vm563_vm15 = vcmp.eq.s32.totalorder %v1637_v24, 3 }
  0x2a   : > { %v540_v26 = vsel %vm537_vm12, %v1634_v23, -1e+30  ;;  %v526_v27 = vsel %vm523_vm13, %v1634_v23, -1e+30  ;;  %v541_v28 = vsel %vm537_vm12, %v1639_v25, -1e+30 }
  0x2b   : > { %v542_v29 = vsel %vm2052_vm11, %v540_v26, -inf  ;;  %v529_v30 = vsel %vm2052_vm11, %v526_v27, -inf  ;;  %v527_v31 = vsel %vm523_vm13, %v1639_v25, -1e+30  ;;  %v545_v32 = vsel %vm2052_vm11, %v541_v28, -inf }
  0x2c   : > { %543 = vmax.xlane.f32.xlu1 %v542_v29  ;;  %530 = vmax.xlane.f32.xlu0 %v529_v30  ;;  %v532_v33 = vsel %vm2052_vm11, %v527_v31, -inf  ;;  %v554_v34 = vsel %vm550_vm14, %v1639_v25, -1e+30  ;;  %v553_v35 = vsel %vm550_vm14, %v1634_v23, -1e+30  ;;  %vm576_vm0 = vcmp.eq.s32.totalorder %v1637_v24, 4 }
  0x2d   : > { %v558_v36 = vsel %vm2052_vm11, %v554_v34, -inf  ;;  %v555_v37 = vsel %vm2052_vm11, %v553_v35, -inf  ;;  %v567_v38 = vsel %vm563_vm15, %v1639_v25, -1e+30  ;;  %v566_v39 = vsel %vm563_vm15, %v1634_v23, -1e+30 }
  0x2e   : > { %v571_v40 = vsel %vm2052_vm11, %v567_v38, -inf  ;;  %v568_v41 = vsel %vm2052_vm11, %v566_v39, -inf  ;;  %v580_v42 = vsel %vm576_vm0, %v1639_v25, -1e+30  ;;  %v579_v43 = vsel %vm576_vm0, %v1634_v23, -1e+30 }
  0x2f   : > { %vm589_vm1 = vcmp.eq.s32.totalorder %v1637_v24, 5  ;;  %v584_v44 = vsel %vm2052_vm11, %v580_v42, -inf  ;;  %v581_v45 = vsel %vm2052_vm11, %v579_v43, -inf  ;;  %vm602_vm2 = vcmp.eq.s32.totalorder %v1637_v24, 6 }
  0x30   : > { %546 = vmax.xlane.f32.xlu1 %v545_v32  ;;  %533 = vmax.xlane.f32.xlu0 %v532_v33  ;;  %v593_v46 = vsel %vm589_vm1, %v1639_v25, -1e+30  ;;  %v592_v47 = vsel %vm589_vm1, %v1634_v23, -1e+30  ;;  %v606_v50 = vsel %vm602_vm2, %v1639_v25, -1e+30 }
  0x31   : > { %v597_v48 = vsel %vm2052_vm11, %v593_v46, -inf  ;;  %v594_v49 = vsel %vm2052_vm11, %v592_v47, -inf  ;;  %v605_v51 = vsel %vm602_vm2, %v1634_v23, -1e+30  ;;  %vm2056_vm3 = vcmp.eq.s32.totalorder %v1637_v24, 7 }
  0x32   : > { %v610_v52 = vsel %vm2052_vm11, %v606_v50, -inf  ;;  %v607_v53 = vsel %vm2052_vm11, %v605_v51, -inf  ;;  %v619_v54 = vsel %vm2056_vm3, %v1639_v25, -1e+30  ;;  %v618_v55 = vsel %vm2056_vm3, %v1634_v23, -1e+30 }
  0x33   : > { %vm2055_vm4 = vcmp.eq.s32.totalorder %v1637_v24, 8  ;;  %v623_v56 = vsel %vm2052_vm11, %v619_v54, -inf  ;;  %v620_v57 = vsel %vm2052_vm11, %v618_v55, -inf  ;;  %vm2054_vm5 = vcmp.eq.s32.totalorder %v1637_v24, 9 }
  0x34   : > { %559 = vmax.xlane.f32.xlu1 %v558_v36  ;;  %556 = vmax.xlane.f32.xlu0 %v555_v37  ;;  %v632_v58 = vsel %vm2055_vm4, %v1639_v25, -1e+30  ;;  %v631_v59 = vsel %vm2055_vm4, %v1634_v23, -1e+30  ;;  %v645_v62 = vsel %vm2054_vm5, %v1639_v25, -1e+30 }
  0x35   : > { %v636_v60 = vsel %vm2052_vm11, %v632_v58, -inf  ;;  %v633_v61 = vsel %vm2052_vm11, %v631_v59, -inf  ;;  %v644_v63 = vsel %vm2054_vm5, %v1634_v23, -1e+30  ;;  %vm2053_vm6 = vcmp.eq.s32.totalorder %v1637_v24, 10 }
  0x36   : > { %v649_v6 = vsel %vm2052_vm11, %v645_v62, -inf  ;;  %v646_v8 = vsel %vm2052_vm11, %v644_v63, -inf  ;;  %v658_v10 = vsel %vm2053_vm6, %v1639_v25, -1e+30  ;;  %v657_v12 = vsel %vm2053_vm6, %v1634_v23, -1e+30 }
  0x37   : > { %vm2051_vm7 = vcmp.eq.s32.totalorder %v1637_v24, 11  ;;  %v662_v14 = vsel %vm2052_vm11, %v658_v10, -inf  ;;  %v659_v16 = vsel %vm2052_vm11, %v657_v12, -inf  ;;  %v1750_v27 = vshrl.u32 %v279_v0, 7 }
  0x38   : > { %572 = vmax.xlane.f32.xlu1 %v571_v40  ;;  %569 = vmax.xlane.f32.xlu0 %v568_v41  ;;  %v671_v18 = vsel %vm2051_vm7, %v1639_v25, -1e+30  ;;  %v670_v20 = vsel %vm2051_vm7, %v1634_v23, -1e+30  ;;  %v1489_v50 = vmov 1.0  }
  0x39   : > { %v675_v22 = vsel %vm2052_vm11, %v671_v18, -inf  ;;  %v672_v26 = vsel %vm2052_vm11, %v670_v20, -inf  ;;  %v1753_v28 = vadd.s32 8, %v1750_v27  ;;  %vm342_vm9 = vcmp.ge.s32.totalorder %v1750_v27, 2 }
  0x3a   : > { %vm352_vm10 = vcmp.ge.s32.totalorder %v1750_v27, 4  ;;  %v347_v31 = vsel %vm342_vm9, 1, %v1486_v2  ;;  %vm367_vm11 = vcmp.ge.s32.totalorder %v1750_v27, 6  ;;  %v339_v37 = vadd.s32 16, %v1750_v27 }
  0x3b   : > { %vm398_vm8 = vcmp.ge.s32.totalorder %v1753_v28, 10  ;;  %vm413_vm7 = vcmp.ge.s32.totalorder %v1753_v28, 12  ;;  %v357_v32 = vsel %vm352_vm10, 1, %v1486_v2  ;;  %vm428_vm6 = vcmp.ge.s32.totalorder %v1753_v28, 14 }
  0x3c   : > { %585 = vmax.xlane.f32.xlu1 %v584_v44  ;;  %582 = vmax.xlane.f32.xlu0 %v581_v45  ;;  %v403_v29 = vsel %vm398_vm8, 1, %v1486_v2  ;;  %v418_v0 = vsel %vm413_vm7, 1, %v1486_v2  ;;  %v362_v33 = vadd.s32 %v357_v32, %v347_v31  ;;  %v372_v35 = vsel %vm367_vm11, 1, %v1486_v2 }
  0x3d   : > { %v408_v30 = vadd.s32 4, %v403_v29  ;;  %v433_v36 = vsel %vm428_vm6, 1, %v1486_v2  ;;  %v340_v40 = vadd.s32 24, %v1750_v27  ;;  %vm459_vm8 = vcmp.ge.s32.totalorder %v339_v37, 18 }
  0x3e   : > { %v377_v38 = vadd.s32 %v372_v35, %v362_v33  ;;  %vm474_vm9 = vcmp.ge.s32.totalorder %v339_v37, 22  ;;  %v464_v41 = vsel %vm459_vm8, 1, %v1486_v2  ;;  %v1487_v44 = vmov 1.0|1.0  }
  0x3f   : > { %v423_v34 = vadd.s32 %v418_v0, %v408_v30  ;;  %v479_v42 = vsel %vm474_vm9, 1, %v1486_v2  ;;  %v469_v43 = vadd.s32 8, %v464_v41  ;;  %vm490_vm11 = vcmp.ge.s32.totalorder %v340_v40, 30 }
  0x40   : > { %598 = vmax.xlane.f32.xlu1 %v597_v48  ;;  %595 = vmax.xlane.f32.xlu0 %v594_v49  ;;  %vm502_vm7 = vcmp.eq.s32.totalorder %v377_v38, %v1569_v1  ;;  %v495_v45 = vsel %vm490_vm11, 1, %v1486_v2  ;;  %vm1190_vm6 = vcmp.eq.s32.totalorder %v1569_v1, 11  ;;  %v1488_v48 = vmov 0.0  }
  0x41   : > { %v438_v39 = vadd.s32 %v433_v36, %v423_v34  ;;  %v484_v46 = vadd.s32 %v479_v42, %v469_v43  ;;  %v500_v47 = vadd.s32 10, %v495_v45  ;;  %v1195_v49 = vsel %vm1190_vm6, 1.0, %v1488_v48 }
  0x42   : > { %vm697_vm9 = vcmask 1046528   ;;  %vm2069_vm11 = vcmp.eq.s32.totalorder %v1637_v24, 11 }
  0x43   : > { %vm503_vm10 = vcmp.eq.s32.totalorder %v438_v39, %v1569_v1  ;;  %vm504_vm4 = vcmp.eq.s32.totalorder %v484_v46, %v1569_v1  ;;  %vm505_vm8 = vcmp.eq.s32.totalorder %v500_v47, %v1569_v1  ;;  %vm2070_vm6 = vmmov %vm2069_vm11 }
  0x44   : > { %611 = vmax.xlane.f32.xlu1 %v610_v52  ;;  %608 = vmax.xlane.f32.xlu0 %v607_v53  ;;  %vm1277_vm5 = vmpackc.low %vm503_vm10, %vm502_vm7  ;;  %vm870_vm7 = vcmask 1043456  }
  0x45   : > { %1286 = vmatprep.subr.msk.bf16.mxu0 %vm1277_vm5, %v1487_v44  ;;  %1278 = vmatprep.subr.msk.bf16.mxu1 %vm1277_vm5, %v1487_v44  ;;  %vm1281_vm3 = vmpackc.low %vm505_vm8, %vm504_vm4  ;;  %vm517_vm4 = vcmp.eq.s32.totalorder %v1637_v24, %v1750_v27  ;;  %vm2071_vm8 = vcmask 318464  }
  0x46   : > { %1288 = vmatpush3.bf16.msk.msra.mxu0 %vm1277_vm5, %v1487_v44  ;;  %1280 = vmatpush3.bf16.msk.msra.mxu1 %vm1277_vm5, %v1487_v44  ;;  %vm518_vm5 = vcmp.eq.s32.totalorder %v1637_v24, %v1753_v28  ;;  %vm1785_vm10 = vmpackc.low %vm870_vm7, %vm517_vm4 }
  0x47   : > { %1290 = vmatprep.subr.msk.bf16.mxu0 %vm1281_vm3, %v1487_v44  ;;  %1282 = vmatprep.subr.msk.bf16.mxu1 %vm1281_vm3, %v1487_v44  ;;  %v1197_v2 = vsel %vm518_vm5, 1.0, %v1488_v48  ;;  %vm863_vm5 = vcmask 97280   ;;  %vm2073_vm4 = vmmov %vm2071_vm8 }
  0x48   : > { %624 = vmax.xlane.f32.xlu1 %v623_v56  ;;  %621 = vmax.xlane.f32.xlu0 %v620_v57  ;;  %v1783_v51 = vpack.c.bf16 %v1197_v2, %v1489_v50  ;;  %vm2074_vm7 = vmmov %vm2073_vm4 }
  0x4a   : > { %1292 = vmatpush3.bf16.msk.msra.mxu0 %vm1281_vm3, %v1487_v44  ;;  %1284 = vmatpush3.bf16.msk.msra.mxu1 %vm1281_vm3, %v1487_v44 }
  0x4b   : > { %1265 = vmatprep.subr.msk.mxu0 %vm697_vm9, %v1195_v49  ;;  %1252 = vmatprep.subr.msk.mxu1 %vm697_vm9, %v1195_v49 }
  0x4c   : > { %637 = vmax.xlane.f32.xlu1 %v636_v60  ;;  %634 = vmax.xlane.f32.xlu0 %v633_v61 }
  0x4e   : > { %1266 = vmatpush3.msk.msra.mxu0 %vm697_vm9, %v1195_v49  ;;  %1253 = vmatpush3.msk.msra.mxu1 %vm697_vm9, %v1195_v49  ;;  %vm2072_vm9 = vmmov %vm2071_vm8 }
  0x4f   : > { %1295 = vmatprep.subr.msk.bf16.mxu1 %vm1785_vm10, %v1783_v51 }
  0x50   : > { %650 = vmax.xlane.f32.xlu1 %v649_v6  ;;  %647 = vmax.xlane.f32.xlu0 %v646_v8 }
  0x54   : > { %663 = vmax.xlane.f32.xlu1 %v662_v14  ;;  %660 = vmax.xlane.f32.xlu0 %v659_v16 }
  0x58   : > { %676 = vmax.xlane.f32.xlu1 %v675_v22  ;;  %673 = vmax.xlane.f32.xlu0 %v672_v26 }
  0xb9   : > { %v544_v53 = vpop.xlane.xlu1 %543  ;;  %v531_v54 = vpop.xlane.xlu0 %530 }
  0xba   : > { %v535_v16 = vsel %vm523_vm13, %v531_v54, -1e+30 }
  0xbb   : > { %v548_v26 = vsel %vm537_vm12, %v544_v53, %v535_v16  ;;  %v960_v16 = vstv %s1863_s9 }
  0xbd   : > { %v547_v55 = vpop.xlane.xlu1 %546  ;;  %v534_v56 = vpop.xlane.xlu0 %533 }
  0xbe   : > { %v536_v18 = vsel %vm523_vm13, %v534_v56, -1e+30 }
  0xbf   : > { %v549_v29 = vsel %vm537_vm12, %v547_v55, %v536_v18  ;;  %vm2061_vm12 = vcmp.eq.s32.totalorder %v1637_v24, 7  ;;  %v1867_v18 = vadd.s32 %v960_v16, %v1753_v28 }
  0xc0   : > { %vm2062_vm13 = vmmov %vm2061_vm12 }
  0xc1   : > { %v560_v57 = vpop.xlane.xlu1 %559  ;;  %v557_v58 = vpop.xlane.xlu0 %556 }
  0xc2   : > { %v562_v30 = vsel %vm550_vm14, %v560_v57, %v549_v29  ;;  %v561_v31 = vsel %vm550_vm14, %v557_v58, %v548_v26  ;;  %vm2063_vm14 = vcmp.eq.s32.totalorder %v1637_v24, 8 }
  0xc5   : > { %v573_v59 = vpop.xlane.xlu1 %572  ;;  %v570_v60 = vpop.xlane.xlu0 %569 }
  0xc6   : > { %v575_v33 = vsel %vm563_vm15, %v573_v59, %v562_v30  ;;  %v574_v34 = vsel %vm563_vm15, %v570_v60, %v561_v31  ;;  %vm2064_vm15 = vmmov %vm2063_vm14 }
  0xc9   : > { %v586_v61 = vpop.xlane.xlu1 %585  ;;  %v583_v62 = vpop.xlane.xlu0 %582 }
  0xca   : > { %v588_v35 = vsel %vm576_vm0, %v586_v61, %v575_v33  ;;  %v587_v36 = vsel %vm576_vm0, %v583_v62, %v574_v34  ;;  %vm2065_vm0 = vcmp.eq.s32.totalorder %v1637_v24, 9 }
  0xcd   : > { %v599_v63 = vpop.xlane.xlu1 %598  ;;  %v596_v6 = vpop.xlane.xlu0 %595 }
  0xce   : > { %v601_v37 = vsel %vm589_vm1, %v599_v63, %v588_v35  ;;  %v600_v38 = vsel %vm589_vm1, %v596_v6, %v587_v36  ;;  %vm2066_vm1 = vmmov %vm2065_vm0  ;;  %v277_v63 = vld [vmem:[%s269_s8] sm:$0xff] }
  0xd1   : > { %v612_v8 = vpop.xlane.xlu1 %611  ;;  %v609_v10 = vpop.xlane.xlu0 %608 }
  0xd2   : > { %v614_v39 = vsel %vm602_vm2, %v612_v8, %v601_v37  ;;  %v613_v40 = vsel %vm602_vm2, %v609_v10, %v600_v38  ;;  %vm2067_vm2 = vcmp.eq.s32.totalorder %v1637_v24, 10  ;;  %v278_v10 = vld [vmem:[%s269_s8 + $0x8] sm:$0xff] }
  0xd3   : > { %vm2068_vm3 = vmmov %vm2067_vm2 }
  0xd5   : > { %v625_v12 = vpop.xlane.xlu1 %624  ;;  %v622_v14 = vpop.xlane.xlu0 %621 }
  0xd6   : > { %v627_v43 = vsel %vm2061_vm12, %v625_v12, %v614_v39  ;;  %v626_v44 = vsel %vm2062_vm13, %v622_v14, %v613_v40  ;;  %v861_v12 = vcvt.s32.f32 %v277_v63  ;;  %v862_v14 = vcvt.s32.f32 %v278_v10 }
  0xd7   : > { %vm964_vm13 = vcmp.ne.s32.totalorder %v278_v10, 4294967295 }
  0xd9   : > { %v638_v20 = vpop.xlane.xlu1 %637  ;;  %v635_v22 = vpop.xlane.xlu0 %634 }
  0xda   : > { %v640_v45 = vsel %vm2063_vm14, %v638_v20, %v627_v43  ;;  %v639_v46 = vsel %vm2064_vm15, %v635_v22, %v626_v44  ;;  %v1870_v20 = vadd.s32 %v960_v16, %v1750_v27  ;;  %vm963_vm14 = vcmp.ne.s32.totalorder %v277_v63, 4294967295 }
  0xdc   : > { %vm965_vm12 = vcmp.lt.s32.totalorder %v1870_v20, 40 }
  0xdd   : > { %v651_v32 = vpop.xlane.xlu1 %650  ;;  %v648_v0 = vpop.xlane.xlu0 %647 }
  0xde   : > { %v653_v47 = vsel %vm2065_vm0, %v651_v32, %v640_v45  ;;  %v652_v49 = vsel %vm2066_vm1, %v648_v0, %v639_v46  ;;  %vm1885_vm0 = vmand %vm963_vm14, %vm965_vm12  ;;  %vm980_vm1 = vcmask 90112  }
  0xdf   : > { %v1219_v22 = vsel %vm1885_vm0, 1.0, %v1488_v48 }
  0xe0   : > { %v986_v26 = vsel %vm863_vm5, %v1219_v22, 0.0 }
  0xe1   : > { %v664_v41 = vpop.xlane.xlu1 %663  ;;  %v661_v42 = vpop.xlane.xlu0 %660 }
  0xe2   : > { %v666_v2 = vsel %vm2067_vm2, %v664_v41, %v653_v47  ;;  %v665_v50 = vsel %vm2068_vm3, %v661_v42, %v652_v49 }
  0xe5   : > { %v677_v53 = vpop.xlane.xlu1 %676  ;;  %v674_v54 = vpop.xlane.xlu0 %673 }
  0xe6   : > { %v679_v55 = vsel %vm2069_vm11, %v677_v53, %v666_v2  ;;  %v678_v56 = vsel %vm2070_vm6, %v674_v54, %v665_v50 }
  0xe7   : > { %v1841_v57 = vsub.f32 %v1639_v25, %v679_v55  ;;  %v1844_v58 = vsub.f32 %v1634_v23, %v678_v56 }
  0xe9   : > { %v684_v59 = vmul.f32 1.442695, %v1841_v57  ;;  %v682_v60 = vmul.f32 1.442695, %v1844_v58 }
  0xeb   : > { %1354 = vpow2.f32 %v684_v59 }
  0xec   : > { %1356 = vpow2.f32 %v682_v60 }
  0xf5   : > { %v1355_v61 = vpop.eup %1354 }
  0xf6   : > { %v1357_v24 = vpop.eup %1356 }
  0xf7   : > { %v686_v62 = vpack.c.bf16 %v1355_v61, %v1357_v24 }
  0xf9   : > { %v687_v25 = vunpack.c.l.bf16 %v686_v62  ;;  %v688_v6 = vunpack.c.h.bf16 %v686_v62 }
  0xfb   : > { %1267 = vmatprep.mubr.msk.f32.mxu0 %vm2071_vm8, %v687_v25  ;;  %v689_v23 = vsub.f32 %v1357_v24, %v687_v25  ;;  %v690_v8 = vsub.f32 %v1355_v61, %v688_v6 }
  0xfc   : > { %1268 = vmatmul.mubr.msk.f32.vlgmr.msra.gmra.mrb[0].mxu0 %vm2072_vm9, %v688_v6 }
  0xfd   : > { %1254 = vmatprep.mubr.msk.f32.mxu1 %vm2073_vm4, %v689_v23 }
  0xfe   : > { %1255 = vmatmul.mubr.msk.f32.vlgmr.msra.gmra.mrb[0].mxu1 %vm2074_vm7, %v690_v8 }
  0xff   : > { %1298 = vmatpush3.bf16.msk.msra.mxu1 %vm1785_vm10, %v1783_v51  ;;  %1274 = vmatprep.mubr.msk.f32.mxu1 %vm863_vm5, %v861_v12  ;;  %vm966_vm10 = vcmp.lt.s32.totalorder %v1867_v18, 40 }
 0x100   : > { %vm1876_vm15 = vmand %vm964_vm13, %vm966_vm10 }
 0x101   : > { %v1220_v28 = vsel %vm1876_vm15, 1.0, %v1488_v48 }
 0x102   : > { %1275 = vmatmul.mubr.msk.f32.vlgmr.msra.gmra.mrb[2].mxu1 %vm863_vm5, %v862_v14  ;;  %v987_v52 = vsel %vm863_vm5, %v1220_v28, 0.0 }
 0x103   : > { %v988_v29 = vadd.f32 %v987_v52, %v986_v26 }
 0x105   : > { %v989_v30 = vrot.slane %v988_v29, 4 }
 0x107   : > { %v990_v31 = vadd.f32 %v989_v30, %v988_v29 }
 0x109   : > { %v991_v32 = vrot.slane %v990_v31, 2 }
 0x10b   : > { %v992_v0 = vadd.f32 %v991_v32, %v990_v31 }
 0x10d   : > { %v993_v33 = vrot.slane %v992_v0, 1 }
 0x10f   : > { %v994_v34 = vadd.f32 %v993_v33, %v992_v0 }
 0x111   : > { %995 = vst.msk [vmem:[%s240_s12] sm:$0x1] %vm980_vm1, %v994_v34 }
 0x112   : > { %1375 = shalt.err (!%p1372_p3)
}
 0x113   : > { %s1376_s5 = scalar_lea.hbm %s1903_s23, 16  ;;  %s1380_s8 = scalar_lea.hbm %s2049_s3, 48 }
 0x114   : > { %p1377_p4 = scmp.ne.s32.totalorder %s1903_s23, %s1376_s5  ;;  %p1381_p9 = scmp.lt.u32.totalorder %s1903_s23, %s2049_s3 }
 0x115   : > { %p1382_p10 = scmp.lt.u32.totalorder %s1380_s8, %s1376_s5  ;;  %p1384_p12 = scmp.lt.u32.totalorder %s1376_s5, %s1903_s23 }
 0x116   : > { %p1378_p7 = pnand %p1377_p4, %p1558_p5 }
 0x117   : > { %p1383_p11 = por %p1382_p10, %p1381_p9 }
 0x118   : > { %p1379_p8 = pneg %p1378_p7 }
 0x119   : > { %p1385_p13 = por %p1384_p12, %p1383_p11 }
 0x11b   : > { %p1386_p0 = pnand %p1385_p13, %p1379_p8 }
 0x11d   : > { %1389 = shalt.err (!%p1386_p0)
}
 0x11e   : > { %1302 = dma.vmem_to_hbm [thread:$0]  (%p1558_p5), %s1905_s13, 16, %s1903_s23, %s1908_s27   ;;  %v283_v35 = vmul.u32 2, %v1576_v3  ;;  %v287_v36 = vmul.u32 2, %v1579_v4  ;;  %vm2079_vm11 = vmmov %vm2073_vm4  ;;  %vm1013_vm8 = vcmask 311296  }
 0x11f   : > { %v292_v38 = vmul.u32 2, %v1582_v5  ;;  %v297_v40 = vmul.u32 2, %v1589_v7  ;;  %vm2080_vm6 = vmmov %vm2073_vm4  ;;  %s246_s13 = scalar_lea.vmem [#allocation6], %s1895_s10  ;;  %s234_s22 = scalar_lea.vmem [#allocation2], %s1895_s10 }
 0x120   : > { %v288_v37 = vadd.s32 %v287_v36, %v283_v35  ;;  %v302_v42 = vmul.u32 2, %v1594_v9  ;;  %v307_v44 = vmul.u32 2, %v1599_v11  ;;  %s1062_s14 = sshll.u32 %s246_s13, 4  ;;  %s1036_s23 = sshll.u32 %s234_s22, 4  ;;  %s1970_s14 = int_to_ptr.vmem [resolvable:$true] %s1062_s14  ;;  %s1978_s23 = int_to_ptr.vmem [resolvable:$true] %s1036_s23 }
 0x121   : > { %v312_v46 = vmul.u32 2, %v1604_v13  ;;  %v317_v3 = vmul.u32 2, %v1611_v15  ;;  %s1968_s29 = scalar_lea.hbm %s2050_s4, %s1863_s9  ;;  %s1976_s6 = scalar_lea.hbm %s2048_s2, %s1863_s9 }
 0x122   : > { %v293_v39 = vadd.s32 %v292_v38, %v288_v37  ;;  %v322_v4 = vmul.u32 2, %v1616_v17  ;;  %v327_v5 = vmul.u32 4, %v1622_v19  ;;  %s1390_s7 = scalar_lea.vmem %s1970_s14, 16  ;;  %s1491_s8 = smov [#allocation6]  }
 0x123   : > { %v332_v7 = vmul.u32 8, %v1631_v21  ;;  %p1391_p1 = scmp.ne.s32.totalorder %s1970_s14, %s1390_s7  ;;  %s1394_s11 = sshll.u32 %s1491_s8, 4  ;;  %s1395_s11 = int_to_ptr.vmem [resolvable:$false] %s1394_s11 }
 0x124   : > { %v298_v41 = vadd.s32 %v297_v40, %v293_v39  ;;  %s1396_s12 = scalar_lea.vmem %s1395_s11, 32  ;;  %p1397_p4 = scmp.lt.s32.totalorder %s1970_s14, %s1395_s11 }
 0x125   : > { %p1392_p2 = pnand %p1391_p1, %p1558_p5  ;;  %p1398_p7 = scmp.lt.s32.totalorder %s1396_s12, %s1390_s7 }
 0x126   : > { %v303_v43 = vadd.s32 %v302_v42, %v298_v41 }
 0x127   : > { %p1393_p3 = pneg %p1392_p2  ;;  %p1399_p8 = por %p1398_p7, %p1397_p4 }
 0x128   : > { %v308_v45 = vadd.s32 %v307_v44, %v303_v43 }
 0x129   : > { %p1400_p9 = pnand %p1399_p8, %p1393_p3 }
 0x12a   : > { %v313_v47 = vadd.s32 %v312_v46, %v308_v45 }
 0x12c   : > { %v318_v49 = vadd.s32 %v317_v3, %v313_v47 }
 0x12e   : > { %v323_v2 = vadd.s32 %v322_v4, %v318_v49 }
 0x130   : > { %v328_v50 = vadd.s32 %v327_v5, %v323_v2 }
 0x132   : > { %v333_v53 = vadd.s32 %v332_v7, %v328_v50 }
 0x134   : > { %v334_v9 = vsub.s32 %v1569_v1, %v333_v53 }
 0x136   : > { %v335_v59 = vcvt.s32.f32 %v334_v9 }
 0x1cf   : > { %v1269_v54 = vpop.f32.mrb[0].mxu0 }
 0x1d0   : > { %v848_v11 = vpop.f32.mrb[1].mxu0 }
 0x1d1   : > { %v1256_v55 = vpop.f32.mrb[0].mxu1 }
 0x1d2   : > { %v854_v56 = vadd.f32 %v1269_v54, %v1256_v55  ;;  %v767_v13 = vpop.f32.mrb[1].mxu1 }
 0x1d3   : > { %v849_v60 = vadd.f32 %v848_v11, %v767_v13 }
 0x1d4   : > { %1358 = vlog2.f32 %v854_v56 }
 0x1d5   : > { %1360 = vlog2.f32 %v849_v60  ;;  %v1276_v15 = vpop.f32.mrb[2].mxu1 }
 0x1d6   : > { %v950_v17 = vsub.f32 %v1276_v15, %v335_v59  ;;  %v940_v61 = vpop.f32.mrb[3].mxu1 }
 0x1d7   : > { %v949_v24 = vsub.f32 %v940_v61, %v335_v59 }
 0x1d8   : > { %v952_v19 = vand.u32 2147483647, %v950_v17 }
 0x1d9   : > { %v951_v62 = vand.u32 2147483647, %v949_v24 }
 0x1da   : > { %vm954_vm2 = vcmp.lt.f32.partialorder %v952_v19, 0.5 }
 0x1db   : > { %v1217_v21 = vsel %vm954_vm2, 1.0, %v1488_v48  ;;  %vm953_vm3 = vcmp.lt.f32.partialorder %v951_v62, 0.5 }
 0x1dc   : > { %v997_v1 = vmul.f32 %v1217_v21, %v1841_v57  ;;  %v1216_v63 = vsel %vm953_vm3, 1.0, %v1488_v48 }
 0x1dd   : > { %v996_v25 = vmul.f32 %v1216_v63, %v1844_v58 }
 0x1de   : > { %v1359_v6 = vpop.eup %1358  ;;  %v1003_v23 = vsel %vm966_vm10, %v997_v1, 0.0 }
 0x1df   : > { %v1361_v8 = vpop.eup %1360  ;;  %v860_v10 = vmul.f32 0.6931472, %v1359_v6  ;;  %v1005_v12 = vsel %vm2079_vm11, %v1003_v23, 0.0  ;;  %v1002_v14 = vsel %vm965_vm12, %v996_v25, 0.0 }
 0x1e0   : > { %v858_v16 = vmul.f32 0.6931472, %v1361_v8  ;;  %v1004_v28 = vsel %vm2080_vm6, %v1002_v14, 0.0 }
 0x1e1   : > { %v970_v48 = vsel %vm1876_vm15, %v860_v10, 0.0  ;;  %v1006_v57 = vadd.f32 %v1005_v12, %v1004_v28 }
 0x1e2   : > { %v972_v58 = vsel %vm863_vm5, %v970_v48, 0.0  ;;  %v969_v18 = vsel %vm1885_vm0, %v858_v16, 0.0 }
 0x1e3   : > { %v971_v52 = vsel %vm863_vm5, %v969_v18, 0.0  ;;  %v1007_v22 = vrot.slane %v1006_v57, 4 }
 0x1e4   : > { %v973_v20 = vadd.f32 %v972_v58, %v971_v52 }
 0x1e5   : > { %v1008_v26 = vadd.f32 %v1007_v22, %v1006_v57 }
 0x1e6   : > { %v974_v29 = vrot.slane %v973_v20, 4 }
 0x1e7   : > { %v1009_v30 = vrot.slane %v1008_v26, 2 }
 0x1e8   : > { %v975_v31 = vadd.f32 %v974_v29, %v973_v20 }
 0x1e9   : > { %v1010_v51 = vadd.f32 %v1009_v30, %v1008_v26 }
 0x1ea   : > { %v976_v32 = vrot.slane %v975_v31, 2 }
 0x1eb   : > { %v1011_v0 = vrot.slane %v1010_v51, 1 }
 0x1ec   : > { %v977_v33 = vadd.f32 %v976_v32, %v975_v31 }
 0x1ed   : > { %v1012_v27 = vadd.f32 %v1011_v0, %v1010_v51 }
 0x1ee   : > { %v978_v34 = vrot.slane %v977_v33, 1 }
 0x1ef   : > { %1014 = vst.msk [vmem:[%s246_s13] sm:$0x1] %vm1013_vm8, %v1012_v27 }
 0x1f0   : > { %v979_v35 = vadd.f32 %v978_v34, %v977_v33 }
 0x1f1   : > { %1403 = shalt.err (!%p1400_p9)
}
 0x1f2   : > { %s1404_s9 = scalar_lea.hbm %s1968_s29, 16  ;;  %s1408_s28 = scalar_lea.hbm %s2050_s4, 48 }
 0x1f3   : > { %p1405_p10 = scmp.ne.s32.totalorder %s1968_s29, %s1404_s9  ;;  %p1409_p13 = scmp.lt.u32.totalorder %s1968_s29, %s2050_s4 }
 0x1f4   : > { %p1410_p0 = scmp.lt.u32.totalorder %s1408_s28, %s1404_s9  ;;  %p1412_p2 = scmp.lt.u32.totalorder %s1404_s9, %s1968_s29 }
 0x1f5   : > { %p1406_p11 = pnand %p1405_p10, %p1558_p5 }
 0x1f6   : > { %p1411_p1 = por %p1410_p0, %p1409_p13 }
 0x1f7   : > { %p1407_p12 = pneg %p1406_p11 }
 0x1f8   : > { %p1413_p3 = por %p1412_p2, %p1411_p1 }
 0x1fa   : > { %p1414_p4 = pnand %p1413_p3, %p1407_p12 }
 0x1fc   : > { %1417 = shalt.err (!%p1414_p4)
}
 0x1fd   : > { %1303 = dma.vmem_to_hbm [thread:$0]  (%p1558_p5), %s1970_s14, 16, %s1968_s29, %s1908_s27   ;;  %981 = vst.msk [vmem:[%s234_s22] sm:$0x1] %vm980_vm1, %v979_v35 }
 0x1fe   : > { %s1016_s7 = scalar_lea.sflag [#allocation3], %s1895_s10  ;;  %s1418_s8 = scalar_lea.vmem %s1978_s23, 16 }
 0x1ff   : > { %p1419_p7 = scmp.ne.s32.totalorder %s1978_s23, %s1418_s8  ;;  %s1492_s11 = smov [#allocation2]  }
 0x200   : > { %s1422_s12 = sshll.u32 %s1492_s11, 4  ;;  %s1423_s12 = int_to_ptr.vmem [resolvable:$false] %s1422_s12 }
 0x201   : > { %p1420_p8 = pnand %p1419_p7, %p1558_p5  ;;  %s1424_s9 = scalar_lea.vmem %s1423_s12, 32 }
 0x202   : > { %p1425_p10 = scmp.lt.s32.totalorder %s1978_s23, %s1423_s12  ;;  %p1426_p11 = scmp.lt.s32.totalorder %s1424_s9, %s1418_s8 }
 0x203   : > { %p1421_p9 = pneg %p1420_p8 }
 0x204   : > { %p1427_p12 = por %p1426_p11, %p1425_p10 }
 0x206   : > { %p1428_p13 = pnand %p1427_p12, %p1421_p9 }
 0x208   : > { %1431 = shalt.err (!%p1428_p13)
}
 0x209   : > { %s1432_s10 = scalar_lea.hbm %s1976_s6, 16  ;;  %s1436_s22 = scalar_lea.hbm %s2048_s2, 48 }
 0x20a   : > { %p1433_p0 = scmp.ne.s32.totalorder %s1976_s6, %s1432_s10  ;;  %p1437_p3 = scmp.lt.u32.totalorder %s1976_s6, %s2048_s2 }
 0x20b   : > { %p1438_p4 = scmp.lt.u32.totalorder %s1436_s22, %s1432_s10  ;;  %p1440_p8 = scmp.lt.u32.totalorder %s1432_s10, %s1976_s6 }
 0x20c   : > { %p1434_p1 = pnand %p1433_p0, %p1558_p5 }
 0x20d   : > { %p1439_p7 = por %p1438_p4, %p1437_p3 }
 0x20e   : > { %p1435_p2 = pneg %p1434_p1 }
 0x20f   : > { %p1441_p9 = por %p1440_p8, %p1439_p7 }
 0x211   : > { %p1442_p10 = pnand %p1441_p9, %p1435_p2 }
 0x213   : > { %1445 = shalt.err (!%p1442_p10)
}
 0x214   : > { %1301 = dma.vmem_to_hbm [thread:$0]  (%p1558_p5), %s1978_s23, 16, %s1976_s6, %s1016_s7  }
 0x215 PF: > { %p1317_p11 = scmp.ge.s32.totalorder %s1484_s18, 2  ;;  %s1074_s19 = sand.u32 1, %s1472_s15  }
 0x216   : > { %s1075_s28 = scalar_lea.sflag [#allocation3], %s1074_s19 }
 0x217   : > { %p1308_p12 = pnand %p1317_p11, %p1562_p6 }
 0x219   : > { %1463 = dma.done.wait (!%p1308_p12), %s1075_s28, 16  }
 0x21a   : > { %1465 = vsyncadd (!%p1308_p12), %s1075_s28, 4294967280  ;;  %s1082_s30 = sand.u32 1, %s1182_s20  }
 0x21b   : > { %s1083_s5 = scalar_lea.sflag [#allocation5], %s1082_s30 }
 0x21c   : > { %1467 = dma.done.wait (!%p1308_p12), %s1083_s5, 32  }
 0x21d   : > { %1469 = vsyncadd (!%p1308_p12), %s1083_s5, 4294967264  ;;  %p18_p5 = scmp.ge.s32.totalorder %s1543_s21, 5   ;;  %s2081_s15 = smov %s1476_s16 }
 0x21e   : > { %s2082_s16 = smov %s1480_s17  ;;  %s2083_s17 = smov %s1556_s24 }
 0x21f   : > { %s2084_s18 = smov %s1543_s21  ;;  %20 = sbr.rel (!%p18_p5) target bundleno = 5 (0x5), region = 98 }
 0x226   :  { %1095 = vsyncpa [#allocation3], 1 }
 0x227   :  { %1097 = vsyncpa [#allocation3 + $0x1], 1 }
 0x228   :  { %1098 = vsyncpa [#allocation5], 1 }
 0x229   :  { %1100 = vsyncpa [#allocation5 + $0x1], 1 }

</bundles_post_ra>
